<compile_context>
chip_gen: v7x
topology: tpu7x:2x2x1
jax: 0.10.0
libtpu: 0.0.40
codegen_flags: <defaults>
</compile_context>

<pallas_src>
import functools

import jax
import jax.numpy as jnp
from jax import lax
from jax.experimental import pallas as pl
from jax.experimental.pallas import tpu as pltpu


def _round_up(x, m):
    return (x + m - 1) // m * m


def _lstm_tagger_kernel(ids_ref, emb_ref, wih_ref, whh_ref, b_ref, wout_ref,
                        bout_ref, out_ref, *, hidden_pad, seq_len):
    """Embedding gather + LSTM recurrence + tag head, all VMEM/vreg-resident.

    ids_ref:  (T,)      int32 token ids (SMEM)
    emb_ref:  (V, E)    f32 embedding table (VMEM)
    wih_ref:  (E, 4*Hp) bf16 input->gates weights, gate order [i,f,o,g], lane-padded
    whh_ref:  (Hp,4*Hp) bf16 hidden->gates weights, rows + gate blocks padded
    b_ref:    (1, 4*Hp) f32 bias_ih + bias_hh, gate order [i,f,o,g], padded
    wout_ref: (Hp, Tp)  bf16 hidden2tag weight, padded
    bout_ref: (1, Tp)   f32 hidden2tag bias, padded cols = -1e30
    out_ref:  (T, Tp)   f32 log_softmax tag scores (padded, lane-dense)
    """
    Hp = hidden_pad
    T = seq_len

    # (0) Fused embedding gather: scalar SMEM ids drive dynamic row slices of the
    #     VMEM-resident table.  Gathered block is cast to bf16 for the MXU.
    rows = [emb_ref[pl.ds(ids_ref[t], 1), :] for t in range(T)]      # each (1, E) f32
    x = jnp.concatenate(rows, axis=0).astype(jnp.bfloat16)           # (T, E) bf16

    # (1) Hoisted input projection: one (T,E)x(E,4Hp) bf16 matmul (f32 acc) + bias,
    #     entirely off the serial recurrence chain.
    gates_x = jnp.dot(x, wih_ref[...],
                      preferred_element_type=jnp.float32) + b_ref[...]  # (T, 4Hp) f32

    whh = whh_ref[...]                                                  # (Hp, 4Hp) bf16

    h = jnp.zeros((1, Hp), jnp.float32)
    c = jnp.zeros((1, Hp), jnp.float32)
    hs = []

    # (2) Fully unrolled recurrence (T is a small static trip count).  Per step:
    #     one M=1 bf16 matmul, sigmoid over 3 gate blocks, tanh over 1 gate block
    #     plus tanh(c), and a few VPU muls/adds.  Gate blocks are 128-lane aligned
    #     so all "slices" are whole-vreg selects (no XLU rotates).
    for t in range(T):
        gates = gates_x[t:t + 1, :] + jnp.dot(
            h.astype(jnp.bfloat16), whh,
            preferred_element_type=jnp.float32)                        # (1, 4Hp) f32

        # Gate order is [i, f, o, g]: sigmoid only on the first 3 blocks,
        # tanh only on the last block.
        s = jax.nn.sigmoid(gates[:, 0:3 * Hp])
        i_g = s[:, 0 * Hp:1 * Hp]
        f_g = s[:, 1 * Hp:2 * Hp]
        o_g = s[:, 2 * Hp:3 * Hp]
        g_g = jnp.tanh(gates[:, 3 * Hp:4 * Hp])

        c = f_g * c + i_g * g_g
        h = o_g * jnp.tanh(c)
        hs.append(h)                       # stays in vregs; no VMEM scratch stores

    hs_all = jnp.concatenate(hs, axis=0)                               # (T, Hp) f32

    # (3) Batched tag head + log_softmax, single lane-dense (T, Tp) store.
    #     Padded tag columns carry bias -1e30 -> exp underflows to 0, so the
    #     softmax over the padded axis equals the softmax over the real tags.
    tag = jnp.dot(hs_all.astype(jnp.bfloat16), wout_ref[...],
                  preferred_element_type=jnp.float32) + bout_ref[...]  # (T, Tp) f32
    m = jnp.max(tag, axis=1, keepdims=True)
    shifted = tag - m
    lse = jnp.log(jnp.sum(jnp.exp(shifted), axis=1, keepdims=True))
    out_ref[...] = shifted - lse


def prepare_params(params):
    """One-time weight re-layout (hoisted out of the per-call forward path).

    Reorders torch gate packing [i,f,g,o] -> [i,f,o,g], pads each gate block to a
    128-lane boundary, pads hidden rows / tag columns, and casts matmul operands
    to bf16.  Returns a dict of device arrays ready for the kernel.
    """
    w_ih = params["w_ih"]                    # (4H, E)  torch layout, gates [i,f,g,o]
    w_hh = params["w_hh"]                    # (4H, H)
    b_ih = params["b_ih"]                    # (4H,)
    b_hh = params["b_hh"]                    # (4H,)
    w_out = params["w_out"]                  # (Tag, H) torch layout
    b_out = params["b_out"]                  # (Tag,)

    H = w_hh.shape[1]
    tagset = w_out.shape[0]
    Hp = _round_up(H, 128)                   # per-gate lane-aligned width
    Tp = _round_up(tagset, 128)              # lane-dense output width
    gate_order = jnp.array([0, 1, 3, 2])     # [i, f, g, o] -> [i, f, o, g]

    def pad_gate_cols(w):                    # (rows, 4H) -> (rows, 4Hp), reordered
        rows = w.shape[0]
        w4 = w.reshape(rows, 4, H)[:, gate_order, :]
        return (jnp.zeros((rows, 4, Hp), jnp.float32)
                .at[:, :, :H].set(w4)
                .reshape(rows, 4 * Hp))

    wih_p = pad_gate_cols(w_ih.T.astype(jnp.float32)).astype(jnp.bfloat16)   # (E, 4Hp)
    whh_p = (jnp.zeros((Hp, 4 * Hp), jnp.float32)
             .at[:H, :].set(pad_gate_cols(w_hh.T.astype(jnp.float32)))
             .astype(jnp.bfloat16))                                          # (Hp, 4Hp)
    b_p = pad_gate_cols((b_ih + b_hh).astype(jnp.float32).reshape(1, -1))    # (1, 4Hp) f32
    wout_p = (jnp.zeros((Hp, Tp), jnp.float32)
              .at[:H, :tagset].set(w_out.T.astype(jnp.float32))
              .astype(jnp.bfloat16))                                         # (Hp, Tp)
    bout_p = (jnp.full((1, Tp), -1e30, jnp.float32)
              .at[0, :tagset].set(b_out.astype(jnp.float32)))                # (1, Tp) f32
    emb = params["embedding"].astype(jnp.float32)                            # (V, E) f32

    return {"emb": emb, "wih": wih_p, "whh": whh_p, "b": b_p,
            "wout": wout_p, "bout": bout_p,
            "H": H, "Hp": Hp, "tagset": tagset, "Tp": Tp}


def lstm_tagger_forward(sentence, packed):
    """sentence: int32 (T,) token ids. Returns (T, tagset_size) log-probs."""
    T = sentence.shape[0]
    Hp, Tp, tagset = packed["Hp"], packed["Tp"], packed["tagset"]

    kernel = functools.partial(_lstm_tagger_kernel, hidden_pad=Hp, seq_len=T)
    vmem = pl.BlockSpec(memory_space=pltpu.MemorySpace.VMEM)
    smem = pl.BlockSpec(memory_space=pltpu.MemorySpace.SMEM)

    out_pad = pl.pallas_call(
        kernel,
        out_shape=jax.ShapeDtypeStruct((T, Tp), jnp.float32),
        in_specs=[smem, vmem, vmem, vmem, vmem, vmem, vmem],
        out_specs=vmem,
    )(sentence.astype(jnp.int32), packed["emb"], packed["wih"], packed["whh"],
      packed["b"], packed["wout"], packed["bout"])

    return out_pad[:, :tagset]


def _reference_forward(sentence, params):
    """Pure-JAX f32 reference matching the PyTorch module semantics."""
    emb = jnp.take(params["embedding"], sentence, axis=0)  # (T, E)
    H = params["w_hh"].shape[1]
    w_ih, w_hh = params["w_ih"], params["w_hh"]
    b = params["b_ih"] + params["b_hh"]

    def step(carry, x_t):
        h, c = carry
        g = x_t @ w_ih.T + h @ w_hh.T + b
        i = jax.nn.sigmoid(g[0 * H:1 * H])
        f = jax.nn.sigmoid(g[1 * H:2 * H])
        gg = jnp.tanh(g[2 * H:3 * H])
        o = jax.nn.sigmoid(g[3 * H:4 * H])
        c = f * c + i * gg
        h = o * jnp.tanh(c)
        return (h, c), h

    (_, _), hs = lax.scan(step, (jnp.zeros(H), jnp.zeros(H)), emb)
    tag = hs @ params["w_out"].T + params["b_out"]
    return jax.nn.log_softmax(tag, axis=1)


def init_params(key, embedding_dim, hidden_dim, vocab_size, tagset_size):
    ks = jax.random.split(key, 7)
    k_lstm = 1.0 / jnp.sqrt(hidden_dim)
    k_lin = 1.0 / jnp.sqrt(hidden_dim)
    return {
        "embedding": jax.random.normal(ks[0], (vocab_size, embedding_dim), jnp.float32),
        "w_ih": jax.random.uniform(ks[1], (4 * hidden_dim, embedding_dim),
                                   jnp.float32, -k_lstm, k_lstm),
        "w_hh": jax.random.uniform(ks[2], (4 * hidden_dim, hidden_dim),
                                   jnp.float32, -k_lstm, k_lstm),
        "b_ih": jax.random.uniform(ks[3], (4 * hidden_dim,), jnp.float32, -k_lstm, k_lstm),
        "b_hh": jax.random.uniform(ks[4], (4 * hidden_dim,), jnp.float32, -k_lstm, k_lstm),
        "w_out": jax.random.uniform(ks[5], (tagset_size, hidden_dim),
                                    jnp.float32, -k_lin, k_lin),
        "b_out": jax.random.uniform(ks[6], (tagset_size,), jnp.float32, -k_lin, k_lin),
    }


if __name__ == "__main__":
    EMBEDDING_DIM = 32
    HIDDEN_DIM = 32
    VOCAB_SIZE = 20
    TAGSET_SIZE = 8
    SEQ_LEN = 8

    key = jax.random.PRNGKey(0)
    k_params, k_sent = jax.random.split(key)
    params = init_params(k_params, EMBEDDING_DIM, HIDDEN_DIM, VOCAB_SIZE, TAGSET_SIZE)
    packed = prepare_params(params)   # one-time re-layout; NOT in the per-call path
    sentence = jax.random.randint(k_sent, (SEQ_LEN,), 0, VOCAB_SIZE, dtype=jnp.int32)

    tag_scores = lstm_tagger_forward(sentence, packed)
    tag_scores = jax.block_until_ready(tag_scores)

    ref = _reference_forward(sentence, params)
    assert tag_scores.shape == (SEQ_LEN, TAGSET_SIZE)
    # bf16 matmul inputs (f32 accumulation) -> loosened tolerance vs f32 reference.
    assert jnp.allclose(tag_scores, ref, atol=5e-2, rtol=5e-2), "mismatch vs reference"

    print("KERNEL_OK")
</pallas_src>

<mosaic_0001>
module attributes {stable_mosaic.version = 11 : i64} {
  func.func @_lstm_tagger_kernel(%arg0: memref<8xi32, #tpu.memory_space<smem>>, %arg1: memref<20x32xf32, #tpu.memory_space<vmem>>, %arg2: memref<32x512xbf16, #tpu.memory_space<vmem>>, %arg3: memref<128x512xbf16, #tpu.memory_space<vmem>>, %arg4: memref<1x512xf32, #tpu.memory_space<vmem>>, %arg5: memref<128x128xbf16, #tpu.memory_space<vmem>>, %arg6: memref<1x128xf32, #tpu.memory_space<vmem>>, %arg7: memref<8x128xf32, #tpu.memory_space<vmem>>) attributes {dimension_semantics = [], scalar_prefetch = 0 : i64, scratch_operands = 0 : i64, tpu.core_type = #tpu.core_type<tc>} {
    %c0 = arith.constant 0 : index
    %0 = memref.load %arg0[%c0] : memref<8xi32, #tpu.memory_space<smem>>
    %1 = arith.index_cast %0 : i32 to index
    %c0_0 = arith.constant 0 : index
    %2 = vector.load %arg1[%1, %c0_0] : memref<20x32xf32, #tpu.memory_space<vmem>>, vector<1x32xf32>
    %c1 = arith.constant 1 : index
    %3 = memref.load %arg0[%c1] : memref<8xi32, #tpu.memory_space<smem>>
    %4 = arith.index_cast %3 : i32 to index
    %c0_1 = arith.constant 0 : index
    %5 = vector.load %arg1[%4, %c0_1] : memref<20x32xf32, #tpu.memory_space<vmem>>, vector<1x32xf32>
    %c2 = arith.constant 2 : index
    %6 = memref.load %arg0[%c2] : memref<8xi32, #tpu.memory_space<smem>>
    %7 = arith.index_cast %6 : i32 to index
    %c0_2 = arith.constant 0 : index
    %8 = vector.load %arg1[%7, %c0_2] : memref<20x32xf32, #tpu.memory_space<vmem>>, vector<1x32xf32>
    %c3 = arith.constant 3 : index
    %9 = memref.load %arg0[%c3] : memref<8xi32, #tpu.memory_space<smem>>
    %10 = arith.index_cast %9 : i32 to index
    %c0_3 = arith.constant 0 : index
    %11 = vector.load %arg1[%10, %c0_3] : memref<20x32xf32, #tpu.memory_space<vmem>>, vector<1x32xf32>
    %c4 = arith.constant 4 : index
    %12 = memref.load %arg0[%c4] : memref<8xi32, #tpu.memory_space<smem>>
    %13 = arith.index_cast %12 : i32 to index
    %c0_4 = arith.constant 0 : index
    %14 = vector.load %arg1[%13, %c0_4] : memref<20x32xf32, #tpu.memory_space<vmem>>, vector<1x32xf32>
    %c5 = arith.constant 5 : index
    %15 = memref.load %arg0[%c5] : memref<8xi32, #tpu.memory_space<smem>>
    %16 = arith.index_cast %15 : i32 to index
    %c0_5 = arith.constant 0 : index
    %17 = vector.load %arg1[%16, %c0_5] : memref<20x32xf32, #tpu.memory_space<vmem>>, vector<1x32xf32>
    %c6 = arith.constant 6 : index
    %18 = memref.load %arg0[%c6] : memref<8xi32, #tpu.memory_space<smem>>
    %19 = arith.index_cast %18 : i32 to index
    %c0_6 = arith.constant 0 : index
    %20 = vector.load %arg1[%19, %c0_6] : memref<20x32xf32, #tpu.memory_space<vmem>>, vector<1x32xf32>
    %c7 = arith.constant 7 : index
    %21 = memref.load %arg0[%c7] : memref<8xi32, #tpu.memory_space<smem>>
    %22 = arith.index_cast %21 : i32 to index
    %c0_7 = arith.constant 0 : index
    %23 = vector.load %arg1[%22, %c0_7] : memref<20x32xf32, #tpu.memory_space<vmem>>, vector<1x32xf32>
    %24 = tpu.concatenate %2, %5, %8, %11, %14, %17, %20, %23 in 0 : vector<1x32xf32>, vector<1x32xf32>, vector<1x32xf32>, vector<1x32xf32>, vector<1x32xf32>, vector<1x32xf32>, vector<1x32xf32>, vector<1x32xf32> -> vector<8x32xf32>
    %25 = arith.truncf %24 : vector<8x32xf32> to vector<8x32xbf16>
    %c0_8 = arith.constant 0 : index
    %c0_9 = arith.constant 0 : index
    %26 = vector.load %arg2[%c0_8, %c0_9] : memref<32x512xbf16, #tpu.memory_space<vmem>>, vector<32x512xbf16>
    %cst = arith.constant dense<0.000000e+00> : vector<8x512xf32>
    %27 = tpu.matmul %25, %26, %cst {dimension_numbers = #tpu.dot_dimension_numbers<[1], [0], [0], [1], [0, 0, 1, 1], [], []>} : vector<8x32xbf16>, vector<32x512xbf16>, vector<8x512xf32> -> vector<8x512xf32>
    %c0_10 = arith.constant 0 : index
    %c0_11 = arith.constant 0 : index
    %28 = vector.load %arg4[%c0_10, %c0_11] : memref<1x512xf32, #tpu.memory_space<vmem>>, vector<1x512xf32>
    %29 = vector.broadcast %28 : vector<1x512xf32> to vector<8x512xf32>
    %30 = arith.addf %27, %29 : vector<8x512xf32>
    %c0_12 = arith.constant 0 : index
    %c0_13 = arith.constant 0 : index
    %31 = vector.load %arg3[%c0_12, %c0_13] : memref<128x512xbf16, #tpu.memory_space<vmem>>, vector<128x512xbf16>
    %cst_14 = arith.constant 0.000000e+00 : f32
    %32 = vector.broadcast %cst_14 : f32 to vector<1x128xf32>
    %cst_15 = arith.constant 0.000000e+00 : f32
    %33 = vector.broadcast %cst_15 : f32 to vector<1x128xf32>
    %34 = vector.extract_strided_slice %30 {offsets = [0, 0], sizes = [1, 512], strides = [1, 1]} : vector<8x512xf32> to vector<1x512xf32>
    %35 = arith.truncf %32 : vector<1x128xf32> to vector<1x128xbf16>
    %cst_16 = arith.constant dense<0.000000e+00> : vector<1x512xf32>
    %36 = tpu.matmul %35, %31, %cst_16 {dimension_numbers = #tpu.dot_dimension_numbers<[1], [0], [0], [1], [0, 0, 1, 1], [], []>} : vector<1x128xbf16>, vector<128x512xbf16>, vector<1x512xf32> -> vector<1x512xf32>
    %37 = arith.addf %34, %36 : vector<1x512xf32>
    %38 = vector.extract_strided_slice %37 {offsets = [0, 0], sizes = [1, 384], strides = [1, 1]} : vector<1x512xf32> to vector<1x384xf32>
    %39 = arith.negf %38 : vector<1x384xf32>
    %40 = math.exp %39 : vector<1x384xf32>
    %cst_17 = arith.constant 1.000000e+00 : f32
    %41 = vector.broadcast %cst_17 : f32 to vector<1x384xf32>
    %42 = arith.addf %41, %40 : vector<1x384xf32>
    %43 = arith.divf %41, %42 : vector<1x384xf32>
    %44 = vector.extract_strided_slice %43 {offsets = [0, 0], sizes = [1, 128], strides = [1, 1]} : vector<1x384xf32> to vector<1x128xf32>
    %45 = vector.extract_strided_slice %43 {offsets = [0, 128], sizes = [1, 128], strides = [1, 1]} : vector<1x384xf32> to vector<1x128xf32>
    %46 = vector.extract_strided_slice %43 {offsets = [0, 256], sizes = [1, 128], strides = [1, 1]} : vector<1x384xf32> to vector<1x128xf32>
    %47 = vector.extract_strided_slice %37 {offsets = [0, 384], sizes = [1, 128], strides = [1, 1]} : vector<1x512xf32> to vector<1x128xf32>
    %48 = math.tanh %47 : vector<1x128xf32>
    %49 = arith.mulf %45, %33 : vector<1x128xf32>
    %50 = arith.mulf %44, %48 : vector<1x128xf32>
    %51 = arith.addf %49, %50 : vector<1x128xf32>
    %52 = math.tanh %51 : vector<1x128xf32>
    %53 = arith.mulf %46, %52 : vector<1x128xf32>
    %54 = vector.extract_strided_slice %30 {offsets = [1, 0], sizes = [1, 512], strides = [1, 1]} : vector<8x512xf32> to vector<1x512xf32>
    %55 = arith.truncf %53 : vector<1x128xf32> to vector<1x128xbf16>
    %cst_18 = arith.constant dense<0.000000e+00> : vector<1x512xf32>
    %56 = tpu.matmul %55, %31, %cst_18 {dimension_numbers = #tpu.dot_dimension_numbers<[1], [0], [0], [1], [0, 0, 1, 1], [], []>} : vector<1x128xbf16>, vector<128x512xbf16>, vector<1x512xf32> -> vector<1x512xf32>
    %57 = arith.addf %54, %56 : vector<1x512xf32>
    %58 = vector.extract_strided_slice %57 {offsets = [0, 0], sizes = [1, 384], strides = [1, 1]} : vector<1x512xf32> to vector<1x384xf32>
    %59 = arith.negf %58 : vector<1x384xf32>
    %60 = math.exp %59 : vector<1x384xf32>
    %cst_19 = arith.constant 1.000000e+00 : f32
    %61 = vector.broadcast %cst_19 : f32 to vector<1x384xf32>
    %62 = arith.addf %61, %60 : vector<1x384xf32>
    %63 = arith.divf %61, %62 : vector<1x384xf32>
    %64 = vector.extract_strided_slice %63 {offsets = [0, 0], sizes = [1, 128], strides = [1, 1]} : vector<1x384xf32> to vector<1x128xf32>
    %65 = vector.extract_strided_slice %63 {offsets = [0, 128], sizes = [1, 128], strides = [1, 1]} : vector<1x384xf32> to vector<1x128xf32>
    %66 = vector.extract_strided_slice %63 {offsets = [0, 256], sizes = [1, 128], strides = [1, 1]} : vector<1x384xf32> to vector<1x128xf32>
    %67 = vector.extract_strided_slice %57 {offsets = [0, 384], sizes = [1, 128], strides = [1, 1]} : vector<1x512xf32> to vector<1x128xf32>
    %68 = math.tanh %67 : vector<1x128xf32>
    %69 = arith.mulf %65, %51 : vector<1x128xf32>
    %70 = arith.mulf %64, %68 : vector<1x128xf32>
    %71 = arith.addf %69, %70 : vector<1x128xf32>
    %72 = math.tanh %71 : vector<1x128xf32>
    %73 = arith.mulf %66, %72 : vector<1x128xf32>
    %74 = vector.extract_strided_slice %30 {offsets = [2, 0], sizes = [1, 512], strides = [1, 1]} : vector<8x512xf32> to vector<1x512xf32>
    %75 = arith.truncf %73 : vector<1x128xf32> to vector<1x128xbf16>
    %cst_20 = arith.constant dense<0.000000e+00> : vector<1x512xf32>
    %76 = tpu.matmul %75, %31, %cst_20 {dimension_numbers = #tpu.dot_dimension_numbers<[1], [0], [0], [1], [0, 0, 1, 1], [], []>} : vector<1x128xbf16>, vector<128x512xbf16>, vector<1x512xf32> -> vector<1x512xf32>
    %77 = arith.addf %74, %76 : vector<1x512xf32>
    %78 = vector.extract_strided_slice %77 {offsets = [0, 0], sizes = [1, 384], strides = [1, 1]} : vector<1x512xf32> to vector<1x384xf32>
    %79 = arith.negf %78 : vector<1x384xf32>
    %80 = math.exp %79 : vector<1x384xf32>
    %cst_21 = arith.constant 1.000000e+00 : f32
    %81 = vector.broadcast %cst_21 : f32 to vector<1x384xf32>
    %82 = arith.addf %81, %80 : vector<1x384xf32>
    %83 = arith.divf %81, %82 : vector<1x384xf32>
    %84 = vector.extract_strided_slice %83 {offsets = [0, 0], sizes = [1, 128], strides = [1, 1]} : vector<1x384xf32> to vector<1x128xf32>
    %85 = vector.extract_strided_slice %83 {offsets = [0, 128], sizes = [1, 128], strides = [1, 1]} : vector<1x384xf32> to vector<1x128xf32>
    %86 = vector.extract_strided_slice %83 {offsets = [0, 256], sizes = [1, 128], strides = [1, 1]} : vector<1x384xf32> to vector<1x128xf32>
    %87 = vector.extract_strided_slice %77 {offsets = [0, 384], sizes = [1, 128], strides = [1, 1]} : vector<1x512xf32> to vector<1x128xf32>
    %88 = math.tanh %87 : vector<1x128xf32>
    %89 = arith.mulf %85, %71 : vector<1x128xf32>
    %90 = arith.mulf %84, %88 : vector<1x128xf32>
    %91 = arith.addf %89, %90 : vector<1x128xf32>
    %92 = math.tanh %91 : vector<1x128xf32>
    %93 = arith.mulf %86, %92 : vector<1x128xf32>
    %94 = vector.extract_strided_slice %30 {offsets = [3, 0], sizes = [1, 512], strides = [1, 1]} : vector<8x512xf32> to vector<1x512xf32>
    %95 = arith.truncf %93 : vector<1x128xf32> to vector<1x128xbf16>
    %cst_22 = arith.constant dense<0.000000e+00> : vector<1x512xf32>
    %96 = tpu.matmul %95, %31, %cst_22 {dimension_numbers = #tpu.dot_dimension_numbers<[1], [0], [0], [1], [0, 0, 1, 1], [], []>} : vector<1x128xbf16>, vector<128x512xbf16>, vector<1x512xf32> -> vector<1x512xf32>
    %97 = arith.addf %94, %96 : vector<1x512xf32>
    %98 = vector.extract_strided_slice %97 {offsets = [0, 0], sizes = [1, 384], strides = [1, 1]} : vector<1x512xf32> to vector<1x384xf32>
    %99 = arith.negf %98 : vector<1x384xf32>
    %100 = math.exp %99 : vector<1x384xf32>
    %cst_23 = arith.constant 1.000000e+00 : f32
    %101 = vector.broadcast %cst_23 : f32 to vector<1x384xf32>
    %102 = arith.addf %101, %100 : vector<1x384xf32>
    %103 = arith.divf %101, %102 : vector<1x384xf32>
    %104 = vector.extract_strided_slice %103 {offsets = [0, 0], sizes = [1, 128], strides = [1, 1]} : vector<1x384xf32> to vector<1x128xf32>
    %105 = vector.extract_strided_slice %103 {offsets = [0, 128], sizes = [1, 128], strides = [1, 1]} : vector<1x384xf32> to vector<1x128xf32>
    %106 = vector.extract_strided_slice %103 {offsets = [0, 256], sizes = [1, 128], strides = [1, 1]} : vector<1x384xf32> to vector<1x128xf32>
    %107 = vector.extract_strided_slice %97 {offsets = [0, 384], sizes = [1, 128], strides = [1, 1]} : vector<1x512xf32> to vector<1x128xf32>
    %108 = math.tanh %107 : vector<1x128xf32>
    %109 = arith.mulf %105, %91 : vector<1x128xf32>
    %110 = arith.mulf %104, %108 : vector<1x128xf32>
    %111 = arith.addf %109, %110 : vector<1x128xf32>
    %112 = math.tanh %111 : vector<1x128xf32>
    %113 = arith.mulf %106, %112 : vector<1x128xf32>
    %114 = vector.extract_strided_slice %30 {offsets = [4, 0], sizes = [1, 512], strides = [1, 1]} : vector<8x512xf32> to vector<1x512xf32>
    %115 = arith.truncf %113 : vector<1x128xf32> to vector<1x128xbf16>
    %cst_24 = arith.constant dense<0.000000e+00> : vector<1x512xf32>
    %116 = tpu.matmul %115, %31, %cst_24 {dimension_numbers = #tpu.dot_dimension_numbers<[1], [0], [0], [1], [0, 0, 1, 1], [], []>} : vector<1x128xbf16>, vector<128x512xbf16>, vector<1x512xf32> -> vector<1x512xf32>
    %117 = arith.addf %114, %116 : vector<1x512xf32>
    %118 = vector.extract_strided_slice %117 {offsets = [0, 0], sizes = [1, 384], strides = [1, 1]} : vector<1x512xf32> to vector<1x384xf32>
    %119 = arith.negf %118 : vector<1x384xf32>
    %120 = math.exp %119 : vector<1x384xf32>
    %cst_25 = arith.constant 1.000000e+00 : f32
    %121 = vector.broadcast %cst_25 : f32 to vector<1x384xf32>
    %122 = arith.addf %121, %120 : vector<1x384xf32>
    %123 = arith.divf %121, %122 : vector<1x384xf32>
    %124 = vector.extract_strided_slice %123 {offsets = [0, 0], sizes = [1, 128], strides = [1, 1]} : vector<1x384xf32> to vector<1x128xf32>
    %125 = vector.extract_strided_slice %123 {offsets = [0, 128], sizes = [1, 128], strides = [1, 1]} : vector<1x384xf32> to vector<1x128xf32>
    %126 = vector.extract_strided_slice %123 {offsets = [0, 256], sizes = [1, 128], strides = [1, 1]} : vector<1x384xf32> to vector<1x128xf32>
    %127 = vector.extract_strided_slice %117 {offsets = [0, 384], sizes = [1, 128], strides = [1, 1]} : vector<1x512xf32> to vector<1x128xf32>
    %128 = math.tanh %127 : vector<1x128xf32>
    %129 = arith.mulf %125, %111 : vector<1x128xf32>
    %130 = arith.mulf %124, %128 : vector<1x128xf32>
    %131 = arith.addf %129, %130 : vector<1x128xf32>
    %132 = math.tanh %131 : vector<1x128xf32>
    %133 = arith.mulf %126, %132 : vector<1x128xf32>
    %134 = vector.extract_strided_slice %30 {offsets = [5, 0], sizes = [1, 512], strides = [1, 1]} : vector<8x512xf32> to vector<1x512xf32>
    %135 = arith.truncf %133 : vector<1x128xf32> to vector<1x128xbf16>
    %cst_26 = arith.constant dense<0.000000e+00> : vector<1x512xf32>
    %136 = tpu.matmul %135, %31, %cst_26 {dimension_numbers = #tpu.dot_dimension_numbers<[1], [0], [0], [1], [0, 0, 1, 1], [], []>} : vector<1x128xbf16>, vector<128x512xbf16>, vector<1x512xf32> -> vector<1x512xf32>
    %137 = arith.addf %134, %136 : vector<1x512xf32>
    %138 = vector.extract_strided_slice %137 {offsets = [0, 0], sizes = [1, 384], strides = [1, 1]} : vector<1x512xf32> to vector<1x384xf32>
    %139 = arith.negf %138 : vector<1x384xf32>
    %140 = math.exp %139 : vector<1x384xf32>
    %cst_27 = arith.constant 1.000000e+00 : f32
    %141 = vector.broadcast %cst_27 : f32 to vector<1x384xf32>
    %142 = arith.addf %141, %140 : vector<1x384xf32>
    %143 = arith.divf %141, %142 : vector<1x384xf32>
    %144 = vector.extract_strided_slice %143 {offsets = [0, 0], sizes = [1, 128], strides = [1, 1]} : vector<1x384xf32> to vector<1x128xf32>
    %145 = vector.extract_strided_slice %143 {offsets = [0, 128], sizes = [1, 128], strides = [1, 1]} : vector<1x384xf32> to vector<1x128xf32>
    %146 = vector.extract_strided_slice %143 {offsets = [0, 256], sizes = [1, 128], strides = [1, 1]} : vector<1x384xf32> to vector<1x128xf32>
    %147 = vector.extract_strided_slice %137 {offsets = [0, 384], sizes = [1, 128], strides = [1, 1]} : vector<1x512xf32> to vector<1x128xf32>
    %148 = math.tanh %147 : vector<1x128xf32>
    %149 = arith.mulf %145, %131 : vector<1x128xf32>
    %150 = arith.mulf %144, %148 : vector<1x128xf32>
    %151 = arith.addf %149, %150 : vector<1x128xf32>
    %152 = math.tanh %151 : vector<1x128xf32>
    %153 = arith.mulf %146, %152 : vector<1x128xf32>
    %154 = vector.extract_strided_slice %30 {offsets = [6, 0], sizes = [1, 512], strides = [1, 1]} : vector<8x512xf32> to vector<1x512xf32>
    %155 = arith.truncf %153 : vector<1x128xf32> to vector<1x128xbf16>
    %cst_28 = arith.constant dense<0.000000e+00> : vector<1x512xf32>
    %156 = tpu.matmul %155, %31, %cst_28 {dimension_numbers = #tpu.dot_dimension_numbers<[1], [0], [0], [1], [0, 0, 1, 1], [], []>} : vector<1x128xbf16>, vector<128x512xbf16>, vector<1x512xf32> -> vector<1x512xf32>
    %157 = arith.addf %154, %156 : vector<1x512xf32>
    %158 = vector.extract_strided_slice %157 {offsets = [0, 0], sizes = [1, 384], strides = [1, 1]} : vector<1x512xf32> to vector<1x384xf32>
    %159 = arith.negf %158 : vector<1x384xf32>
    %160 = math.exp %159 : vector<1x384xf32>
    %cst_29 = arith.constant 1.000000e+00 : f32
    %161 = vector.broadcast %cst_29 : f32 to vector<1x384xf32>
    %162 = arith.addf %161, %160 : vector<1x384xf32>
    %163 = arith.divf %161, %162 : vector<1x384xf32>
    %164 = vector.extract_strided_slice %163 {offsets = [0, 0], sizes = [1, 128], strides = [1, 1]} : vector<1x384xf32> to vector<1x128xf32>
    %165 = vector.extract_strided_slice %163 {offsets = [0, 128], sizes = [1, 128], strides = [1, 1]} : vector<1x384xf32> to vector<1x128xf32>
    %166 = vector.extract_strided_slice %163 {offsets = [0, 256], sizes = [1, 128], strides = [1, 1]} : vector<1x384xf32> to vector<1x128xf32>
    %167 = vector.extract_strided_slice %157 {offsets = [0, 384], sizes = [1, 128], strides = [1, 1]} : vector<1x512xf32> to vector<1x128xf32>
    %168 = math.tanh %167 : vector<1x128xf32>
    %169 = arith.mulf %165, %151 : vector<1x128xf32>
    %170 = arith.mulf %164, %168 : vector<1x128xf32>
    %171 = arith.addf %169, %170 : vector<1x128xf32>
    %172 = math.tanh %171 : vector<1x128xf32>
    %173 = arith.mulf %166, %172 : vector<1x128xf32>
    %174 = vector.extract_strided_slice %30 {offsets = [7, 0], sizes = [1, 512], strides = [1, 1]} : vector<8x512xf32> to vector<1x512xf32>
    %175 = arith.truncf %173 : vector<1x128xf32> to vector<1x128xbf16>
    %cst_30 = arith.constant dense<0.000000e+00> : vector<1x512xf32>
    %176 = tpu.matmul %175, %31, %cst_30 {dimension_numbers = #tpu.dot_dimension_numbers<[1], [0], [0], [1], [0, 0, 1, 1], [], []>} : vector<1x128xbf16>, vector<128x512xbf16>, vector<1x512xf32> -> vector<1x512xf32>
    %177 = arith.addf %174, %176 : vector<1x512xf32>
    %178 = vector.extract_strided_slice %177 {offsets = [0, 0], sizes = [1, 384], strides = [1, 1]} : vector<1x512xf32> to vector<1x384xf32>
    %179 = arith.negf %178 : vector<1x384xf32>
    %180 = math.exp %179 : vector<1x384xf32>
    %cst_31 = arith.constant 1.000000e+00 : f32
    %181 = vector.broadcast %cst_31 : f32 to vector<1x384xf32>
    %182 = arith.addf %181, %180 : vector<1x384xf32>
    %183 = arith.divf %181, %182 : vector<1x384xf32>
    %184 = vector.extract_strided_slice %183 {offsets = [0, 0], sizes = [1, 128], strides = [1, 1]} : vector<1x384xf32> to vector<1x128xf32>
    %185 = vector.extract_strided_slice %183 {offsets = [0, 128], sizes = [1, 128], strides = [1, 1]} : vector<1x384xf32> to vector<1x128xf32>
    %186 = vector.extract_strided_slice %183 {offsets = [0, 256], sizes = [1, 128], strides = [1, 1]} : vector<1x384xf32> to vector<1x128xf32>
    %187 = vector.extract_strided_slice %177 {offsets = [0, 384], sizes = [1, 128], strides = [1, 1]} : vector<1x512xf32> to vector<1x128xf32>
    %188 = math.tanh %187 : vector<1x128xf32>
    %189 = arith.mulf %185, %171 : vector<1x128xf32>
    %190 = arith.mulf %184, %188 : vector<1x128xf32>
    %191 = arith.addf %189, %190 : vector<1x128xf32>
    %192 = math.tanh %191 : vector<1x128xf32>
    %193 = arith.mulf %186, %192 : vector<1x128xf32>
    %194 = tpu.concatenate %53, %73, %93, %113, %133, %153, %173, %193 in 0 : vector<1x128xf32>, vector<1x128xf32>, vector<1x128xf32>, vector<1x128xf32>, vector<1x128xf32>, vector<1x128xf32>, vector<1x128xf32>, vector<1x128xf32> -> vector<8x128xf32>
    %195 = arith.truncf %194 : vector<8x128xf32> to vector<8x128xbf16>
    %c0_32 = arith.constant 0 : index
    %c0_33 = arith.constant 0 : index
    %196 = vector.load %arg5[%c0_32, %c0_33] : memref<128x128xbf16, #tpu.memory_space<vmem>>, vector<128x128xbf16>
    %cst_34 = arith.constant dense<0.000000e+00> : vector<8x128xf32>
    %197 = tpu.matmul %195, %196, %cst_34 {dimension_numbers = #tpu.dot_dimension_numbers<[1], [0], [0], [1], [0, 0, 1, 1], [], []>} : vector<8x128xbf16>, vector<128x128xbf16>, vector<8x128xf32> -> vector<8x128xf32>
    %c0_35 = arith.constant 0 : index
    %c0_36 = arith.constant 0 : index
    %198 = vector.load %arg6[%c0_35, %c0_36] : memref<1x128xf32, #tpu.memory_space<vmem>>, vector<1x128xf32>
    %199 = vector.broadcast %198 : vector<1x128xf32> to vector<8x128xf32>
    %200 = arith.addf %197, %199 : vector<8x128xf32>
    %cst_37 = arith.constant dense<0xFF800000> : vector<8xf32>
    %201 = vector.multi_reduction <maximumf>, %200, %cst_37 [1] : vector<8x128xf32> to vector<8xf32>
    %202 = vector.shape_cast %201 : vector<8xf32> to vector<8x1xf32>
    %203 = vector.broadcast %202 : vector<8x1xf32> to vector<8x128xf32>
    %204 = arith.subf %200, %203 : vector<8x128xf32>
    %205 = math.exp %204 : vector<8x128xf32>
    %cst_38 = arith.constant dense<0.000000e+00> : vector<8xf32>
    %206 = vector.multi_reduction <add>, %205, %cst_38 [1] : vector<8x128xf32> to vector<8xf32>
    %207 = vector.shape_cast %206 : vector<8xf32> to vector<8x1xf32>
    %208 = math.log %207 : vector<8x1xf32>
    %209 = vector.broadcast %208 : vector<8x1xf32> to vector<8x128xf32>
    %210 = arith.subf %204, %209 : vector<8x128xf32>
    %c0_39 = arith.constant 0 : index
    %c0_40 = arith.constant 0 : index
    %211 = vector.load %arg7[%c0_39, %c0_40] : memref<8x128xf32, #tpu.memory_space<vmem>>, vector<8x128xf32>
    tpu.vector_store %arg7[%c0_39, %c0_40], %210 {strides = array<i32>} : memref<8x128xf32, #tpu.memory_space<vmem>>, vector<8x128xf32>,
    return
  }
}

</mosaic_0001>

<bundles_post_ra>
// kernel: tpu_custom_call.1
= control target key start
LH: loop header
LB: loop body
LE: loop exit
PB: predicated region body
PF: predicated region fallthrough
CT: control target
= control target key end

     0   :  { %12 = vsyncpa [#allocation5], 0  ;;  %s2771_s0 = inlined_call_operand.hbm [shape: s32[8], index: 0, kind: input, shape index: {}]   ;;  %s2772_s1 = inlined_call_operand.hbm [shape: f32[20,32], index: 1, kind: input, shape index: {}]   ;;  %s2773_s2 = inlined_call_operand.hbm [shape: bf16[32,512], index: 2, kind: input, shape index: {}]   ;;  %s2774_s3 = inlined_call_operand.hbm [shape: bf16[128,512], index: 3, kind: input, shape index: {}]   ;;  %s2775_s4 = inlined_call_operand.vmem [shape: f32[1,512], index: 4, kind: input, shape index: {}]   ;;  %s2776_s5 = inlined_call_operand.hbm [shape: bf16[128,128], index: 5, kind: input, shape index: {}]   ;;  %s2777_s6 = inlined_call_operand.vmem [shape: f32[1,128], index: 6, kind: input, shape index: {}]   ;;  %s2778_s7 = inlined_call_operand.hbm [shape: f32[8,128], index: 7, kind: output, shape index: {}]  }
   0x1   :  { %13 = vsyncpa [#allocation3], 0 }
   0x2   :  { %14 = vsyncpa [#allocation8], 0 }
   0x3   :  { %15 = vsyncpa [#allocation11], 0 }
   0x4   :  { %16 = vsyncpa [#allocation4], 0  ;;  %s2161_s24 = smov [#allocation7]   ;;  %s2031_s28 = scalar_lea.hbm %s2773_s2, 1024 }
   0x5   :  { %s42_s25 = sshll.u32 %s2161_s24, 4  ;;  %p2032_p0 = scmp.ne.s32.totalorder %s2773_s2, %s2031_s28  ;;  %s43_s25 = int_to_ptr.vmem [resolvable:$true] %s42_s25 }
   0x6   :  { %p2035_p1 = scmp.lt.u32.totalorder %s2031_s28, %s2773_s2 }
   0x8   :  { %p2037_p2 = pnand %p2035_p1, %p2032_p0 }
   0xa   :  { %2040 = shalt.err (!%p2037_p2)
}
   0xb   :  { %s2041_s10 = scalar_lea.vmem %s43_s25, 1024  ;;  %p2046_p4 = scmp.lt.s32.totalorder %s43_s25, %s43_s25 }
   0xc   :  { %p2042_p3 = scmp.ne.s32.totalorder %s43_s25, %s2041_s10  ;;  %p2047_p5 = scmp.lt.s32.totalorder %s2041_s10, %s2041_s10 }
   0xe   :  { %p2048_p6 = por %p2047_p5, %p2046_p4 }
  0x10   :  { %p2049_p7 = pnand %p2048_p6, %p2042_p3 }
  0x12   :  { %2052 = shalt.err (!%p2049_p7)
}
  0x13   :  { %s2162_s11 = smov 256   ;;  %s2163_s12 = smov 16  }
  0x14   :  { %48 = dma.hbm_to_vmem [thread:$0]  %s2773_s2, 1024, %s43_s25, [#allocation8], %s2162_s11, %s2162_s11, %s2163_s12  }
  0x15   :  { %s2053_s17 = scalar_lea.hbm %s2771_s0, 16 }
  0x16   :  { %p2054_p8 = scmp.ne.s32.totalorder %s2771_s0, %s2053_s17  ;;  %p2057_p9 = scmp.lt.u32.totalorder %s2053_s17, %s2771_s0 }
  0x18   :  { %p2059_p10 = pnand %p2057_p9, %p2054_p8 }
  0x1a   :  { %2062 = shalt.err (!%p2059_p10)
}
  0x1b   :  { %s2164_s22 = smov [#allocation2]   ;;  %s2165_s2 = smov [#allocation6]  }
  0x1c   :  { %24 = dma.hbm_to_smem %s2771_s0, 16, %s2164_s22, [#allocation5]  }
  0x1d   :  { %s30_s25 = sshll.u32 %s2165_s2, 4  ;;  %s2063_s28 = scalar_lea.hbm %s2772_s1, 384  ;;  %s31_s25 = int_to_ptr.vmem [resolvable:$true] %s30_s25 }
  0x1e   :  { %p2064_p11 = scmp.ne.s32.totalorder %s2772_s1, %s2063_s28  ;;  %p2067_p12 = scmp.lt.u32.totalorder %s2063_s28, %s2772_s1 }
  0x20   :  { %p2069_p13 = pnand %p2067_p12, %p2064_p11 }
  0x22   :  { %2072 = shalt.err (!%p2069_p13)
}
  0x23   :  { %s2073_s10 = scalar_lea.vmem %s31_s25, 384  ;;  %p2078_p1 = scmp.lt.s32.totalorder %s31_s25, %s31_s25 }
  0x24   :  { %p2074_p0 = scmp.ne.s32.totalorder %s31_s25, %s2073_s10  ;;  %p2079_p2 = scmp.lt.s32.totalorder %s2073_s10, %s2073_s10 }
  0x26   :  { %p2080_p3 = por %p2079_p2, %p2078_p1 }
  0x28   :  { %p2081_p4 = pnand %p2080_p3, %p2074_p0 }
  0x2a   :  { %2084 = shalt.err (!%p2081_p4)
}
  0x2b   :  { %s2166_s0 = smov 128   ;;  %s2167_s13 = smov 8  }
  0x2c   :  { %36 = dma.hbm_to_vmem [thread:$0]  %s2772_s1, 384, %s31_s25, [#allocation3], %s2166_s0, %s2166_s0, %s2167_s13  }
  0x2d   :  { %s2168_s16 = smov [#allocation9]   ;;  %s2169_s18 = smov [#allocation10]  }
  0x2e   :  { %s54_s17 = sshll.u32 %s2168_s16, 4  ;;  %s68_s19 = sshll.u32 %s2169_s18, 4  ;;  %s55_s17 = int_to_ptr.vmem [resolvable:$true] %s54_s17  ;;  %s69_s19 = int_to_ptr.vmem [resolvable:$true] %s68_s19 }
  0x2f   :  { %s2085_s22 = scalar_lea.hbm %s2774_s3, 4096 }
  0x30   :  { %p2086_p5 = scmp.ne.s32.totalorder %s2774_s3, %s2085_s22  ;;  %p2089_p6 = scmp.lt.u32.totalorder %s2085_s22, %s2774_s3 }
  0x32   :  { %p2091_p7 = pnand %p2089_p6, %p2086_p5 }
  0x34   :  { %2094 = shalt.err (!%p2091_p7)
}
  0x35   :  { %s2095_s1 = scalar_lea.vmem %s55_s17, 4096  ;;  %p2100_p9 = scmp.lt.s32.totalorder %s55_s17, %s55_s17 }
  0x36   :  { %p2096_p8 = scmp.ne.s32.totalorder %s55_s17, %s2095_s1  ;;  %p2101_p10 = scmp.lt.s32.totalorder %s2095_s1, %s2095_s1 }
  0x38   :  { %p2102_p11 = por %p2101_p10, %p2100_p9 }
  0x3a   :  { %p2103_p12 = pnand %p2102_p11, %p2096_p8 }
  0x3c   :  { %2106 = shalt.err (!%p2103_p12)
}
  0x3d   :  { %60 = dma.hbm_to_vmem [thread:$0]  %s2774_s3, 4096, %s55_s17, [#allocation8], %s2162_s11, %s2162_s11, %s2163_s12  }
  0x3e   :  { %s2107_s30 = scalar_lea.hbm %s2776_s5, 1024 }
  0x3f   :  { %p2108_p13 = scmp.ne.s32.totalorder %s2776_s5, %s2107_s30  ;;  %p2111_p0 = scmp.lt.u32.totalorder %s2107_s30, %s2776_s5 }
  0x41   :  { %p2113_p1 = pnand %p2111_p0, %p2108_p13 }
  0x43   :  { %2116 = shalt.err (!%p2113_p1)
}
  0x44   :  { %s2117_s13 = scalar_lea.vmem %s69_s19, 1024  ;;  %p2122_p3 = scmp.lt.s32.totalorder %s69_s19, %s69_s19 }
  0x45   :  { %p2118_p2 = scmp.ne.s32.totalorder %s69_s19, %s2117_s13  ;;  %p2123_p4 = scmp.lt.s32.totalorder %s2117_s13, %s2117_s13 }
  0x47   :  { %p2124_p5 = por %p2123_p4, %p2122_p3 }
  0x49   :  { %p2125_p6 = pnand %p2124_p5, %p2118_p2 }
  0x4b   :  { %2128 = shalt.err (!%p2125_p6)
}
  0x4c   :  { %s2170_s3 = smov 64   ;;  %s2171_s11 = smov 4  }
  0x4d   :  { %74 = dma.hbm_to_vmem [thread:$0]  %s2776_s5, 1024, %s69_s19, [#allocation11], %s2170_s3, %s2170_s3, %s2171_s11  }
  0x4e   :  { %2151 = dma.done.wait [#allocation5], 16  }
  0x4f   :  { %2152 = vsyncadd [#allocation5], 4294967280 }
  0x50   :  { %2153 = dma.done.wait [#allocation3], 384  }
  0x51   :  { %2154 = vsyncadd [#allocation3], 4294966912 }
  0x52   :  { %2155 = dma.done.wait [#allocation8], 5120  }
  0x53   :  { %2156 = vsyncadd [#allocation8], 4294962176 }
  0x54   :  { %2157 = dma.done.wait [#allocation11], 1024  }
  0x55   :  { %2158 = vsyncadd [#allocation11], 4294966272 }
  0x56   :  { %92 = sfence }
  0x57   :  { %v2282_v0 = vld [vmem:[#allocation9 + $0x4] ss:$16 sps:$4 sm:$0xff]   ;;  %v2284_v1 = vld [vmem:[#allocation9] ss:$16 sps:$4 sm:$0xff]   ;;  %v2172_v2 = vmov 0   ;;  %s94_s15 = sld [smem:[#allocation2]] }
  0x58   :  { %260 = vmatprep.mubr.bf16.mxu1 %v2172_v2  ;;  %534 = vmatprep.mubr.bf16.mxu0 %v2172_v2  ;;  %v2289_v3 = vld [vmem:[#allocation9 + $0x24] ss:$16 sps:$4 sm:$0xff]   ;;  %v2291_v4 = vld [vmem:[#allocation9 + $0x20] ss:$16 sps:$4 sm:$0xff]   ;;  %s1673_s5 = sld [smem:[#allocation2 + $0x1]]  ;;  %s1674_s16 = sld [smem:[#allocation2 + $0x2]] }
  0x59   :  { %502 = vmatprep.subr.bf16.mxu0 %v2282_v0  ;;  %v1805_v5 = vld [vmem:[#allocation7 + $0x4] ss:$16 sps:$4 sm:$0xff]   ;;  %v1807_v6 = vld [vmem:[#allocation7] ss:$16 sps:$4 sm:$0xff]   ;;  %s1675_s17 = sld [smem:[#allocation2 + $0x3]]  ;;  %s2305_s18 = sld [smem:[#allocation2 + $0x4]] }
  0x5a   :  { %503 = vmatpush1.bf16.msra.mxu0 %v2284_v1  ;;  %v2295_v7 = vld [vmem:[#allocation9 + $0x44] ss:$16 sps:$4 sm:$0xff]   ;;  %228 = vmatprep.subr.bf16.mxu1 %v1805_v5  ;;  %v1813_v9 = vld [vmem:[#allocation7 + $0x20] ss:$16 sps:$4 sm:$0xff]   ;;  %v1819_v13 = vld [vmem:[#allocation7 + $0xc] ss:$16 sps:$4 sm:$0xff]   ;;  %v164_v5 = vlaneseq }
  0x5b   :  { %504 = vmatprep.subr.bf16.mxu0 %v2289_v3  ;;  %229 = vmatpush1.bf16.msra.mxu1 %v1807_v6  ;;  %v1811_v8 = vld [vmem:[#allocation7 + $0x24] ss:$16 sps:$4 sm:$0xff]   ;;  %v2298_v10 = vld [vmem:[#allocation9 + $0x40] ss:$16 sps:$4 sm:$0xff]   ;;  %s2307_s20 = sld [smem:[#allocation2 + $0x5]]  ;;  %vm139_vm0 = vcmask 1040384  }
  0x5c   :  { %230 = vmatprep.subr.bf16.mxu1 %v1811_v8  ;;  %v2301_v11 = vld [vmem:[#allocation9 + $0x64] ss:$16 sps:$4 sm:$0xff]   ;;  %v2303_v12 = vld [vmem:[#allocation9 + $0x60] ss:$16 sps:$4 sm:$0xff]   ;;  %s1678_s22 = sld [smem:[#allocation2 + $0x6]]  ;;  %vm141_vm1 = vcmask 1041408  }
  0x5d   :  { %s95_s19 = scalar_lea.vmem [#allocation6], %s94_s15  ;;  %s1679_s24 = sld [smem:[#allocation2 + $0x7]]  ;;  %v2311_v19 = vld [vmem:[#allocation9 + $0x84] ss:$16 sps:$4 sm:$0xff]   ;;  %vm143_vm2 = vcmask 1042432   ;;  %vm145_vm3 = vcmask 1043456  }
  0x5e   :  { %505 = vmatpush1.bf16.msra.mxu0 %v2291_v4  ;;  %v96_v14 = vld [vmem:[%s95_s19] sm:$0x1]  ;;  %s98_s21 = scalar_lea.vmem [#allocation6], %s1673_s5  ;;  %s101_s23 = scalar_lea.vmem [#allocation6], %s1674_s16  ;;  %vm147_vm4 = vcmask 1044480   ;;  %vm149_vm5 = vcmask 1045504  }
  0x5f   :  { %506 = vmatprep.subr.bf16.mxu0 %v2295_v7  ;;  %231 = vmatpush1.bf16.msra.mxu1 %v1813_v9  ;;  %v99_v15 = vld [vmem:[%s98_s21] sm:$0x1]  ;;  %s104_s2 = scalar_lea.vmem [#allocation6], %s1675_s17  ;;  %s107_s26 = scalar_lea.vmem [#allocation6], %s2305_s18  ;;  %v2321_v28 = vld [vmem:[#allocation9 + $0xa4] ss:$16 sps:$4 sm:$0xff]  }
  0x60   :  { %269 = vmatprep.subr.bf16.mxu1 %v1819_v13  ;;  %v102_v16 = vld [vmem:[%s101_s23] sm:$0x1]  ;;  %v119_v17 = vrot.slane %v99_v15, 7  ;;  %vm151_vm6 = vcmask 1046528   ;;  %v2330_v38 = vld [vmem:[#allocation9 + $0xc4] ss:$16 sps:$4 sm:$0xff]  }
  0x61   :  { %v122_v18 = vrot.slane %v102_v16, 6  ;;  %v105_v21 = vld [vmem:[%s104_s2] sm:$0x1]  ;;  %s110_s1 = scalar_lea.vmem [#allocation6], %s2307_s20  ;;  %v1817_v40 = vld [vmem:[#allocation7 + $0x8] ss:$16 sps:$4 sm:$0xff]  }
  0x62   :  { %507 = vmatpush1.bf16.msra.mxu0 %v2298_v10  ;;  %v140_v20 = vsel %vm139_vm0, %v96_v14, %v119_v17  ;;  %v2316_v23 = vld [vmem:[#allocation9 + $0x80] ss:$16 sps:$4 sm:$0xff]   ;;  %v125_v25 = vrot.slane %v105_v21, 5  ;;  %s113_s25 = scalar_lea.vmem [#allocation6], %s1678_s22  ;;  %vm224_vm7 = vcmask 261120   ;;  %v165_v13 = vshrl.u32 %v164_v5, 7 }
  0x63   :  { %508 = vmatprep.subr.bf16.mxu0 %v2301_v11  ;;  %v142_v22 = vsel %vm141_vm1, %v140_v20, %v122_v18  ;;  %v108_v24 = vld [vmem:[%s107_s26] sm:$0x1]  ;;  %s116_s27 = scalar_lea.vmem [#allocation6], %s1679_s24  ;;  %v1825_v43 = vld [vmem:[#allocation7 + $0x2c] ss:$16 sps:$4 sm:$0xff]   ;;  %vm2174_vm8 = vmmov 0  }
  0x64   :  { %v111_v26 = vld [vmem:[%s110_s1] sm:$0x1]  ;;  %v128_v27 = vrot.slane %v108_v24, 4  ;;  %v144_v31 = vsel %vm143_vm2, %v142_v22, %v125_v25  ;;  %v2338_v45 = vld [vmem:[#allocation9 + $0xe4] ss:$16 sps:$4 sm:$0xff]   ;;  %v170_v15 = vsub.s32 1, %v165_v13 }
  0x65   :  { %v114_v29 = vld [vmem:[%s113_s25] sm:$0x1]  ;;  %v131_v30 = vrot.slane %v111_v26, 3  ;;  %v1823_v46 = vld [vmem:[#allocation7 + $0x28] ss:$16 sps:$4 sm:$0xff]   ;;  %v166_v17 = vsub.s32 0, %v165_v13 }
  0x66   :  { %509 = vmatpush1.bf16.msra.mxu0 %v2303_v12  ;;  %v117_v32 = vld [vmem:[%s116_s27] sm:$0x1]  ;;  %v134_v33 = vrot.slane %v114_v29, 2  ;;  %v146_v34 = vsel %vm145_vm3, %v144_v31, %v128_v27  ;;  %v2342_v47 = vld [vmem:[#allocation9 + $0xc] ss:$16 sps:$4 sm:$0xff]   ;;  %s2175_s8 = smov [#allocation12]  }
  0x67   :  { %510 = vmatprep.subr.bf16.mxu0 %v2311_v19  ;;  %v2326_v35 = vld [vmem:[#allocation9 + $0xa0] ss:$16 sps:$4 sm:$0xff]   ;;  %v137_v36 = vrot.slane %v117_v32, 1  ;;  %v148_v37 = vsel %vm147_vm4, %v146_v34, %v131_v30  ;;  %v2348_v49 = vld [vmem:[#allocation9 + $0x8] ss:$16 sps:$4 sm:$0xff]   ;;  %s1653_s9 = sshll.u32 %s2175_s8, 4  ;;  %s1654_s9 = int_to_ptr.vmem [resolvable:$true] %s1653_s9 }
  0x68   :  { %v150_v39 = vsel %vm149_vm5, %v148_v37, %v134_v33  ;;  %v2335_v44 = vld [vmem:[#allocation9 + $0xc0] ss:$16 sps:$4 sm:$0xff]   ;;  %v2351_v50 = vld [vmem:[#allocation9 + $0x2c] ss:$16 sps:$4 sm:$0xff]   ;;  %v2354_v51 = vld [vmem:[#allocation9 + $0x28] ss:$16 sps:$4 sm:$0xff]   ;;  %p2134_p8 = scmp.lt.s32.totalorder %s1654_s9, %s1654_s9 }
  0x69   :  { %v152_v41 = vsel %vm151_vm6, %v150_v39, %v137_v36  ;;  %v2345_v48 = vld [vmem:[#allocation9 + $0xe0] ss:$16 sps:$4 sm:$0xff]   ;;  %v2358_v52 = vld [vmem:[#allocation9 + $0x4c] ss:$16 sps:$4 sm:$0xff]   ;;  %v2368_v53 = vld [vmem:[#allocation9 + $0x48] ss:$16 sps:$4 sm:$0xff]  }
  0x6a   :  { %511 = vmatpush1.bf16.msra.mxu0 %v2316_v23  ;;  %v153_v42 = vpack.c.bf16 %v152_v41, %v152_v41  ;;  %v2371_v54 = vld [vmem:[#allocation9 + $0x6c] ss:$16 sps:$4 sm:$0xff]   ;;  %v2376_v55 = vld [vmem:[#allocation9 + $0x68] ss:$16 sps:$4 sm:$0xff]   ;;  %v162_v16 = vld [vmem:[%s2775_s4] sm:$0xf] }
  0x6b   :  { %512 = vmatprep.subr.bf16.mxu0 %v2321_v28  ;;  %v2379_v56 = vld [vmem:[#allocation9 + $0x8c] ss:$16 sps:$4 sm:$0xff]   ;;  %v2384_v57 = vld [vmem:[#allocation9 + $0x88] ss:$16 sps:$4 sm:$0xff]   ;;  %v171_v25 = vrot.slane %v162_v16, %v170_v15  ;;  %v167_v29 = vrot.slane %v162_v16, %v166_v17  ;;  %v174_v39 = vsub.s32 2, %v165_v13 }
  0x6c   :  { %1688 = vmatmul.mubr.msk.bf16.vlgmr.msra.gmra.mrb[0].mxu1 %vm224_vm7, %v153_v42  ;;  %v2387_v58 = vld [vmem:[#allocation9 + $0xac] ss:$16 sps:$4 sm:$0xff]   ;;  %v2392_v59 = vld [vmem:[#allocation9 + $0xa8] ss:$16 sps:$4 sm:$0xff]  }
  0x6d   :  { %270 = vmatpush1.bf16.msra.mxu1 %v1817_v40  ;;  %301 = vmatprep.mubr.bf16.mxu1 %v2172_v2  ;;  %v2395_v60 = vld [vmem:[#allocation9 + $0xcc] ss:$16 sps:$4 sm:$0xff]   ;;  %v2400_v61 = vld [vmem:[#allocation9 + $0xc8] ss:$16 sps:$4 sm:$0xff]   ;;  %v178_v40 = vsub.s32 3, %v165_v13 }
  0x6e   :  { %513 = vmatpush1.bf16.msra.mxu0 %v2326_v35  ;;  %271 = vmatprep.subr.bf16.mxu1 %v1825_v43  ;;  %v2403_v62 = vld [vmem:[#allocation9 + $0xec] ss:$16 sps:$4 sm:$0xff]   ;;  %v2408_v63 = vld [vmem:[#allocation9 + $0xe8] ss:$16 sps:$4 sm:$0xff]  }
  0x6f   :  { %514 = vmatprep.subr.bf16.mxu0 %v2330_v38 }
  0x71   :  { %272 = vmatpush1.bf16.msra.mxu1 %v1823_v46  ;;  %v179_v46 = vrot.slane %v162_v16, %v178_v40 }
  0x72   :  { %515 = vmatpush1.bf16.msra.mxu0 %v2335_v44  ;;  %543 = vmatprep.subr.bf16.mxu1 %v2342_v47 }
  0x73   :  { %516 = vmatprep.subr.bf16.mxu0 %v2338_v45 }
  0x74   :  { %1689 = vmatmul.mubr.msk.bf16.vlgmr.msra.gmra.mrb[4].mxu1 %vm224_vm7, %v153_v42  ;;  %v175_v42 = vrot.slane %v162_v16, %v174_v39 }
  0x75   :  { %544 = vmatpush1.bf16.msra.mxu1 %v2348_v49  ;;  %575 = vmatprep.mubr.bf16.mxu1 %v2172_v2 }
  0x76   :  { %517 = vmatpush1.bf16.msra.mxu0 %v2345_v48  ;;  %545 = vmatprep.subr.bf16.mxu1 %v2351_v50 }
  0x77   :  { %613 = vmatprep.subr.bf16.mxu0 %v2282_v0 }
  0x79   :  { %535 = vmatmul.mubr.bf16.vlgmr.msra.gmra.mrb[0].mxu0 %v2172_v2  ;;  %546 = vmatpush1.bf16.msra.mxu1 %v2354_v51 }
  0x7a   :  { %614 = vmatpush1.bf16.msra.mxu0 %v2284_v1  ;;  %645 = vmatprep.mubr.bf16.mxu0 %v2172_v2 }
  0x7b   :  { %615 = vmatprep.subr.bf16.mxu0 %v2289_v3  ;;  %547 = vmatprep.subr.bf16.mxu1 %v2358_v52 }
  0x7d   :  { %548 = vmatpush1.bf16.msra.mxu1 %v2368_v53 }
  0x7e   :  { %616 = vmatpush1.bf16.msra.mxu0 %v2291_v4  ;;  %549 = vmatprep.subr.bf16.mxu1 %v2371_v54 }
  0x7f   :  { %617 = vmatprep.subr.bf16.mxu0 %v2295_v7 }
  0x81   :  { %550 = vmatpush1.bf16.msra.mxu1 %v2376_v55 }
  0x82   :  { %618 = vmatpush1.bf16.msra.mxu0 %v2298_v10  ;;  %551 = vmatprep.subr.bf16.mxu1 %v2379_v56 }
  0x83   :  { %619 = vmatprep.subr.bf16.mxu0 %v2301_v11 }
  0x85   :  { %552 = vmatpush1.bf16.msra.mxu1 %v2384_v57 }
  0x86   :  { %620 = vmatpush1.bf16.msra.mxu0 %v2303_v12  ;;  %553 = vmatprep.subr.bf16.mxu1 %v2387_v58 }
  0x87   :  { %621 = vmatprep.subr.bf16.mxu0 %v2311_v19 }
  0x89   :  { %554 = vmatpush1.bf16.msra.mxu1 %v2392_v59 }
  0x8a   :  { %622 = vmatpush1.bf16.msra.mxu0 %v2316_v23  ;;  %555 = vmatprep.subr.bf16.mxu1 %v2395_v60 }
  0x8b   :  { %623 = vmatprep.subr.bf16.mxu0 %v2321_v28 }
  0x8d   :  { %556 = vmatpush1.bf16.msra.mxu1 %v2400_v61 }
  0x8e   :  { %624 = vmatpush1.bf16.msra.mxu0 %v2326_v35  ;;  %557 = vmatprep.subr.bf16.mxu1 %v2403_v62 }
  0x8f   :  { %625 = vmatprep.subr.bf16.mxu0 %v2330_v38 }
  0x91   :  { %558 = vmatpush1.bf16.msra.mxu1 %v2408_v63 }
  0x92   :  { %626 = vmatpush1.bf16.msra.mxu0 %v2335_v44  ;;  %654 = vmatprep.subr.bf16.mxu1 %v2342_v47 }
  0x93   :  { %627 = vmatprep.subr.bf16.mxu0 %v2338_v45 }
  0x94   :  { %576 = vmatmul.mubr.bf16.vlgmr.msra.gmra.mrb[8].mxu1 %v2172_v2 }
  0x95   :  { %655 = vmatpush1.bf16.msra.mxu1 %v2348_v49  ;;  %686 = vmatprep.mubr.bf16.mxu1 %v2172_v2 }
  0x96   :  { %628 = vmatpush1.bf16.msra.mxu0 %v2345_v48  ;;  %656 = vmatprep.subr.bf16.mxu1 %v2351_v50 }
  0x97   :  { %743 = vmatprep.subr.bf16.mxu0 %v2282_v0 }
  0x99   :  { %657 = vmatpush1.bf16.msra.mxu1 %v2354_v51 }
  0x9a   :  { %658 = vmatprep.subr.bf16.mxu1 %v2358_v52 }
  0x9d   :  { %659 = vmatpush1.bf16.msra.mxu1 %v2368_v53 }
  0x9e   :  { %660 = vmatprep.subr.bf16.mxu1 %v2371_v54 }
  0xa1   :  { %661 = vmatpush1.bf16.msra.mxu1 %v2376_v55 }
  0xa2   :  { %662 = vmatprep.subr.bf16.mxu1 %v2379_v56 }
  0xa5   :  { %663 = vmatpush1.bf16.msra.mxu1 %v2384_v57 }
  0xa6   :  { %664 = vmatprep.subr.bf16.mxu1 %v2387_v58 }
  0xa9   :  { %665 = vmatpush1.bf16.msra.mxu1 %v2392_v59 }
  0xaa   :  { %666 = vmatprep.subr.bf16.mxu1 %v2395_v60 }
  0xad   :  { %667 = vmatpush1.bf16.msra.mxu1 %v2400_v61 }
  0xae   :  { %668 = vmatprep.subr.bf16.mxu1 %v2403_v62 }
  0xb1   :  { %669 = vmatpush1.bf16.msra.mxu1 %v2408_v63 }
  0xb2   :  { %784 = vmatprep.subr.bf16.mxu1 %v2342_v47 }
 0x13f   :  { %v262_v6 = vpop.f32.mrb[0].mxu1 }
 0x140   :  { %v264_v8 = vpop.f32.mrb[1].mxu1  ;;  %v2440_v32 = vadd.f32 %v262_v6, %v167_v29 }
 0x141   :  { %v266_v9 = vpop.f32.mrb[2].mxu1  ;;  %v2438_v31 = vadd.f32 %v264_v8, %v171_v25 }
 0x142   :  { %v267_v14 = vpop.f32.mrb[3].mxu1 }
 0x147   :  { %v303_v18 = vpop.f32.mrb[4].mxu1 }
 0x148   :  { %v305_v20 = vpop.f32.mrb[5].mxu1  ;;  %v2444_v9 = vadd.f32 %v303_v18, %v175_v42 }
 0x149   :  { %v307_v22 = vpop.f32.mrb[6].mxu1  ;;  %v2446_v6 = vadd.f32 %v305_v20, %v179_v46 }
 0x14a   :  { %v308_v26 = vpop.f32.mrb[7].mxu1 }
 0x14c   :  { %v536_v21 = vpop.f32.mrb[0].mxu0 }
 0x14d   :  { %v538_v24 = vpop.f32.mrb[1].mxu0  ;;  %v584_v34 = vadd.f32 %v536_v21, %v2440_v32 }
 0x14e   :  { %v540_v27 = vpop.f32.mrb[2].mxu0  ;;  %v585_v33 = vadd.f32 %v538_v24, %v2438_v31 }
 0x14f   :  { %v541_v30 = vpop.f32.mrb[3].mxu0  ;;  %v1722_v37 = vmul.f32 -1.442695, %v584_v34 }
 0x150   :  { %v1723_v36 = vmul.f32 -1.442695, %v585_v33 }
 0x152   :  { %1867 = vpow2.f32 %v1723_v36 }
 0x153   :  { %1869 = vpow2.f32 %v1722_v37 }
 0x15c   :  { %v1868_v41 = vpop.eup %1867 }
 0x15d   :  { %v1870_v43 = vpop.eup %1869  ;;  %v598_v5 = vadd.f32 1.0, %v1868_v41 }
 0x15e   :  { %v597_v8 = vadd.f32 1.0, %v1870_v43 }
 0x15f   :  { %1871 = vrcp.f32 %v598_v5 }
 0x160   :  { %1873 = vrcp.f32 %v597_v8 }
 0x167   :  { %v577_v14 = vpop.f32.mrb[8].mxu1 }
 0x168   :  { %v586_v15 = vadd.f32 %v577_v14, %v2444_v9  ;;  %v579_v17 = vpop.f32.mrb[9].mxu1 }
 0x169   :  { %v587_v21 = vadd.f32 %v579_v17, %v2446_v6  ;;  %v581_v22 = vpop.f32.mrb[10].mxu1  ;;  %v1872_v16 = vpop.eup %1871 }
 0x16a   :  { %v1724_v13 = vmul.f32 -1.442695, %v586_v15  ;;  %v582_v24 = vpop.f32.mrb[11].mxu1  ;;  %v1874_v25 = vpop.eup %1873  ;;  %v607_v27 = vmul.f32 0.0, %v1872_v16 }
 0x16b   :  { %1875 = vtanh.f32 %v587_v21 }
 0x16c   :  { %1877 = vpow2.f32 %v1724_v13 }
 0x175   :  { %v1876_v18 = vpop.eup %1875 }
 0x176   :  { %v1878_v26 = vpop.eup %1877  ;;  %v608_v20 = vmul.f32 %v1876_v18, %v1874_v25 }
 0x177   :  { %v599_v29 = vadd.f32 1.0, %v1878_v26 }
 0x178   :  { %v2450_v30 = vadd.f32 %v608_v20, %v607_v27 }
 0x179   :  { %1879 = vrcp.f32 %v599_v29 }
 0x17a   :  { %1881 = vtanh.f32 %v2450_v30 }
 0x183   :  { %v1880_v33 = vpop.eup %1879 }
 0x184   :  { %v1882_v34 = vpop.eup %1881 }
 0x185   :  { %v2453_v36 = vmul.f32 %v1882_v34, %v1880_v33 }
 0x187   :  { %v612_v37 = vpack.c.bf16 %v2453_v36, %v2453_v36 }
 0x189   :  { %646 = vmatmul.mubr.bf16.vlgmr.msra.gmra.mrb[4].mxu0 %v612_v37  ;;  %687 = vmatmul.mubr.bf16.vlgmr.msra.gmra.mrb[12].mxu1 %v612_v37 }
 0x18a   :  { %744 = vmatpush1.bf16.msra.mxu0 %v2284_v1  ;;  %785 = vmatpush1.bf16.msra.mxu1 %v2348_v49 }
 0x18b   :  { %745 = vmatprep.subr.bf16.mxu0 %v2289_v3  ;;  %786 = vmatprep.subr.bf16.mxu1 %v2351_v50 }
 0x18c   :  { %775 = vmatprep.mubr.bf16.mxu0 %v2172_v2  ;;  %816 = vmatprep.mubr.bf16.mxu1 %v2172_v2 }
 0x18e   :  { %746 = vmatpush1.bf16.msra.mxu0 %v2291_v4  ;;  %787 = vmatpush1.bf16.msra.mxu1 %v2354_v51 }
 0x18f   :  { %747 = vmatprep.subr.bf16.mxu0 %v2295_v7  ;;  %788 = vmatprep.subr.bf16.mxu1 %v2358_v52 }
 0x192   :  { %748 = vmatpush1.bf16.msra.mxu0 %v2298_v10  ;;  %789 = vmatpush1.bf16.msra.mxu1 %v2368_v53 }
 0x193   :  { %749 = vmatprep.subr.bf16.mxu0 %v2301_v11  ;;  %790 = vmatprep.subr.bf16.mxu1 %v2371_v54 }
 0x196   :  { %750 = vmatpush1.bf16.msra.mxu0 %v2303_v12  ;;  %791 = vmatpush1.bf16.msra.mxu1 %v2376_v55 }
 0x197   :  { %751 = vmatprep.subr.bf16.mxu0 %v2311_v19  ;;  %792 = vmatprep.subr.bf16.mxu1 %v2379_v56 }
 0x19a   :  { %752 = vmatpush1.bf16.msra.mxu0 %v2316_v23  ;;  %793 = vmatpush1.bf16.msra.mxu1 %v2384_v57 }
 0x19b   :  { %753 = vmatprep.subr.bf16.mxu0 %v2321_v28  ;;  %794 = vmatprep.subr.bf16.mxu1 %v2387_v58 }
 0x19e   :  { %754 = vmatpush1.bf16.msra.mxu0 %v2326_v35  ;;  %795 = vmatpush1.bf16.msra.mxu1 %v2392_v59 }
 0x19f   :  { %755 = vmatprep.subr.bf16.mxu0 %v2330_v38  ;;  %796 = vmatprep.subr.bf16.mxu1 %v2395_v60 }
 0x1a2   :  { %756 = vmatpush1.bf16.msra.mxu0 %v2335_v44  ;;  %797 = vmatpush1.bf16.msra.mxu1 %v2400_v61 }
 0x1a3   :  { %757 = vmatprep.subr.bf16.mxu0 %v2338_v45  ;;  %798 = vmatprep.subr.bf16.mxu1 %v2403_v62 }
 0x1a6   :  { %758 = vmatpush1.bf16.msra.mxu0 %v2345_v48  ;;  %799 = vmatpush1.bf16.msra.mxu1 %v2408_v63 }
 0x1a7   :  { %872 = vmatprep.subr.bf16.mxu0 %v2282_v0  ;;  %913 = vmatprep.subr.bf16.mxu1 %v2342_v47 }
 0x25c   :  { %v647_v39 = vpop.f32.mrb[4].mxu0  ;;  %v688_v40 = vpop.f32.mrb[12].mxu1 }
 0x25d   :  { %v699_v41 = vrot.slane %v647_v39, 7  ;;  %v649_v42 = vpop.f32.mrb[5].mxu0  ;;  %v690_v43 = vpop.f32.mrb[13].mxu1  ;;  %v701_v24 = vrot.slane %v688_v40, 7  ;;  %v731_v40 = vrot.slane %v2450_v30, 7 }
 0x25e   :  { %v700_v46 = vrot.slane %v649_v42, 7  ;;  %v651_v5 = vpop.f32.mrb[6].mxu0  ;;  %v692_v8 = vpop.f32.mrb[14].mxu1  ;;  %v702_v16 = vrot.slane %v690_v43, 7 }
 0x25f   :  { %v707_v14 = vadd.f32 %v699_v41, %v2440_v32  ;;  %v652_v15 = vpop.f32.mrb[7].mxu0  ;;  %v693_v17 = vpop.f32.mrb[15].mxu1  ;;  %v709_v25 = vadd.f32 %v701_v24, %v2444_v9 }
 0x260   :  { %v708_v21 = vadd.f32 %v700_v46, %v2438_v31  ;;  %v710_v18 = vadd.f32 %v702_v16, %v2446_v6 }
 0x261   :  { %v1725_v22 = vmul.f32 -1.442695, %v707_v14  ;;  %v1727_v26 = vmul.f32 -1.442695, %v709_v25 }
 0x262   :  { %v1726_v13 = vmul.f32 -1.442695, %v708_v21 }
 0x263   :  { %1883 = vpow2.f32 %v1725_v22 }
 0x264   :  { %1885 = vpow2.f32 %v1726_v13 }
 0x265   :  { %1887 = vtanh.f32 %v710_v18 }
 0x266   :  { %1889 = vpow2.f32 %v1727_v26 }
 0x26d   :  { %v1884_v27 = vpop.eup %1883 }
 0x26e   :  { %v720_v20 = vadd.f32 1.0, %v1884_v27  ;;  %v1886_v29 = vpop.eup %1885 }
 0x26f   :  { %v721_v33 = vadd.f32 1.0, %v1886_v29  ;;  %v1888_v34 = vpop.eup %1887 }
 0x270   :  { %1891 = vrcp.f32 %v720_v20  ;;  %v1890_v37 = vpop.eup %1889 }
 0x271   :  { %1893 = vrcp.f32 %v721_v33  ;;  %v722_v43 = vadd.f32 1.0, %v1890_v37 }
 0x273   :  { %1895 = vrcp.f32 %v722_v43 }
 0x27a   :  { %v1892_v39 = vpop.eup %1891 }
 0x27b   :  { %v734_v41 = vmul.f32 %v1892_v39, %v1888_v34  ;;  %v1894_v42 = vpop.eup %1893 }
 0x27c   :  { %v733_v46 = vmul.f32 %v1894_v42, %v731_v40 }
 0x27d   :  { %v1896_v8 = vpop.eup %1895 }
 0x27e   :  { %v2496_v5 = vadd.f32 %v734_v41, %v733_v46 }
 0x280   :  { %1897 = vtanh.f32 %v2496_v5 }
 0x28a   :  { %v1898_v14 = vpop.eup %1897 }
 0x28b   :  { %v2499_v15 = vmul.f32 %v1898_v14, %v1896_v8 }
 0x28d   :  { %v738_v17 = vpack.c.bf16 %v2499_v15, %v2499_v15 }
 0x28f   :  { %v740_v21 = vshrl.u32 %v738_v17, 16 }
 0x291   :  { %776 = vmatmul.mubr.bf16.vlgmr.msra.gmra.mrb[8].mxu0 %v740_v21  ;;  %817 = vmatmul.mubr.bf16.vlgmr.msra.gmra.mrb[16].mxu1 %v740_v21 }
 0x292   :  { %873 = vmatpush1.bf16.msra.mxu0 %v2284_v1  ;;  %914 = vmatpush1.bf16.msra.mxu1 %v2348_v49 }
 0x293   :  { %874 = vmatprep.subr.bf16.mxu0 %v2289_v3  ;;  %915 = vmatprep.subr.bf16.mxu1 %v2351_v50 }
 0x294   :  { %904 = vmatprep.mubr.bf16.mxu0 %v2172_v2  ;;  %945 = vmatprep.mubr.bf16.mxu1 %v2172_v2 }
 0x296   :  { %875 = vmatpush1.bf16.msra.mxu0 %v2291_v4  ;;  %916 = vmatpush1.bf16.msra.mxu1 %v2354_v51 }
 0x297   :  { %876 = vmatprep.subr.bf16.mxu0 %v2295_v7  ;;  %917 = vmatprep.subr.bf16.mxu1 %v2358_v52 }
 0x29a   :  { %877 = vmatpush1.bf16.msra.mxu0 %v2298_v10  ;;  %918 = vmatpush1.bf16.msra.mxu1 %v2368_v53 }
 0x29b   :  { %878 = vmatprep.subr.bf16.mxu0 %v2301_v11  ;;  %919 = vmatprep.subr.bf16.mxu1 %v2371_v54 }
 0x29e   :  { %879 = vmatpush1.bf16.msra.mxu0 %v2303_v12  ;;  %920 = vmatpush1.bf16.msra.mxu1 %v2376_v55 }
 0x29f   :  { %880 = vmatprep.subr.bf16.mxu0 %v2311_v19  ;;  %921 = vmatprep.subr.bf16.mxu1 %v2379_v56 }
 0x2a2   :  { %881 = vmatpush1.bf16.msra.mxu0 %v2316_v23  ;;  %922 = vmatpush1.bf16.msra.mxu1 %v2384_v57 }
 0x2a3   :  { %882 = vmatprep.subr.bf16.mxu0 %v2321_v28  ;;  %923 = vmatprep.subr.bf16.mxu1 %v2387_v58 }
 0x2a6   :  { %883 = vmatpush1.bf16.msra.mxu0 %v2326_v35  ;;  %924 = vmatpush1.bf16.msra.mxu1 %v2392_v59 }
 0x2a7   :  { %884 = vmatprep.subr.bf16.mxu0 %v2330_v38  ;;  %925 = vmatprep.subr.bf16.mxu1 %v2395_v60 }
 0x2aa   :  { %885 = vmatpush1.bf16.msra.mxu0 %v2335_v44  ;;  %926 = vmatpush1.bf16.msra.mxu1 %v2400_v61 }
 0x2ab   :  { %886 = vmatprep.subr.bf16.mxu0 %v2338_v45  ;;  %927 = vmatprep.subr.bf16.mxu1 %v2403_v62 }
 0x2ae   :  { %887 = vmatpush1.bf16.msra.mxu0 %v2345_v48  ;;  %928 = vmatpush1.bf16.msra.mxu1 %v2408_v63 }
 0x2af   :  { %1003 = vmatprep.subr.bf16.mxu0 %v2282_v0  ;;  %1044 = vmatprep.subr.bf16.mxu1 %v2342_v47 }
 0x364   :  { %v777_v30 = vpop.f32.mrb[8].mxu0  ;;  %v818_v22 = vpop.f32.mrb[16].mxu1 }
 0x365   :  { %v829_v13 = vrot.slane %v777_v30, 6  ;;  %v779_v24 = vpop.f32.mrb[9].mxu0  ;;  %v820_v16 = vpop.f32.mrb[17].mxu1  ;;  %v831_v39 = vrot.slane %v818_v22, 6  ;;  %v861_v22 = vrot.slane %v2496_v5, 7 }
 0x366   :  { %v830_v25 = vrot.slane %v779_v24, 6  ;;  %v781_v18 = vpop.f32.mrb[10].mxu0  ;;  %v822_v26 = vpop.f32.mrb[18].mxu1  ;;  %v832_v40 = vrot.slane %v820_v16, 6 }
 0x367   :  { %v837_v27 = vadd.f32 %v829_v13, %v2440_v32  ;;  %v782_v20 = vpop.f32.mrb[11].mxu0  ;;  %v823_v29 = vpop.f32.mrb[19].mxu1  ;;  %v839_v41 = vadd.f32 %v831_v39, %v2444_v9 }
 0x368   :  { %v838_v33 = vadd.f32 %v830_v25, %v2438_v31  ;;  %v840_v42 = vadd.f32 %v832_v40, %v2446_v6 }
 0x369   :  { %v1728_v34 = vmul.f32 -1.442695, %v837_v27  ;;  %v1730_v43 = vmul.f32 -1.442695, %v839_v41 }
 0x36a   :  { %v1729_v37 = vmul.f32 -1.442695, %v838_v33  ;;  %v1517_v33 = vsel %vm139_vm0, %v2453_v36, %v2499_v15 }
 0x36b   :  { %1899 = vpow2.f32 %v1728_v34 }
 0x36c   :  { %1901 = vpow2.f32 %v1729_v37 }
 0x36d   :  { %1903 = vtanh.f32 %v840_v42 }
 0x36e   :  { %1905 = vpow2.f32 %v1730_v43 }
 0x375   :  { %v1900_v46 = vpop.eup %1899 }
 0x376   :  { %v850_v8 = vadd.f32 1.0, %v1900_v46  ;;  %v1902_v14 = vpop.eup %1901 }
 0x377   :  { %v851_v17 = vadd.f32 1.0, %v1902_v14  ;;  %v1904_v21 = vpop.eup %1903 }
 0x378   :  { %1907 = vrcp.f32 %v850_v8  ;;  %v1906_v30 = vpop.eup %1905 }
 0x379   :  { %1909 = vrcp.f32 %v851_v17  ;;  %v852_v25 = vadd.f32 1.0, %v1906_v30 }
 0x37b   :  { %1911 = vrcp.f32 %v852_v25 }
 0x382   :  { %v1908_v13 = vpop.eup %1907 }
 0x383   :  { %v864_v24 = vmul.f32 %v1908_v13, %v1904_v21  ;;  %v1910_v16 = vpop.eup %1909 }
 0x384   :  { %v863_v18 = vmul.f32 %v1910_v16, %v861_v22 }
 0x385   :  { %v1912_v27 = vpop.eup %1911 }
 0x386   :  { %v2542_v26 = vadd.f32 %v864_v24, %v863_v18 }
 0x388   :  { %1913 = vtanh.f32 %v2542_v26  ;;  %v990_v18 = vrot.slane %v2542_v26, 7  ;;  %v2597_v26 = vld [vmem:[#allocation9] ss:$16 sps:$4 sm:$0xff]  }
 0x392   :  { %v1914_v20 = vpop.eup %1913 }
 0x393   :  { %v867_v29 = vmul.f32 %v1914_v20, %v1912_v27 }
 0x395   :  { %v868_v34 = vpack.c.bf16 %v867_v29, %v867_v29  ;;  %v2549_v37 = vsel %vm141_vm1, %v1517_v33, %v867_v29 }
 0x397   :  { %v870_v5 = vrot.slane %v868_v34, 1 }
 0x399   :  { %905 = vmatmul.mubr.bf16.vlgmr.msra.gmra.mrb[12].mxu0 %v870_v5  ;;  %946 = vmatmul.mubr.bf16.vlgmr.msra.gmra.mrb[20].mxu1 %v870_v5 }
 0x39a   :  { %1004 = vmatpush1.bf16.msra.mxu0 %v2284_v1  ;;  %1045 = vmatpush1.bf16.msra.mxu1 %v2348_v49 }
 0x39b   :  { %1005 = vmatprep.subr.bf16.mxu0 %v2289_v3  ;;  %1046 = vmatprep.subr.bf16.mxu1 %v2351_v50 }
 0x39c   :  { %1035 = vmatprep.mubr.bf16.mxu0 %v2172_v2  ;;  %1076 = vmatprep.mubr.bf16.mxu1 %v2172_v2 }
 0x39e   :  { %1006 = vmatpush1.bf16.msra.mxu0 %v2291_v4  ;;  %1047 = vmatpush1.bf16.msra.mxu1 %v2354_v51 }
 0x39f   :  { %1007 = vmatprep.subr.bf16.mxu0 %v2295_v7  ;;  %1048 = vmatprep.subr.bf16.mxu1 %v2358_v52 }
 0x3a2   :  { %1008 = vmatpush1.bf16.msra.mxu0 %v2298_v10  ;;  %1049 = vmatpush1.bf16.msra.mxu1 %v2368_v53 }
 0x3a3   :  { %1009 = vmatprep.subr.bf16.mxu0 %v2301_v11  ;;  %1050 = vmatprep.subr.bf16.mxu1 %v2371_v54 }
 0x3a6   :  { %1010 = vmatpush1.bf16.msra.mxu0 %v2303_v12  ;;  %1051 = vmatpush1.bf16.msra.mxu1 %v2376_v55 }
 0x3a7   :  { %1011 = vmatprep.subr.bf16.mxu0 %v2311_v19  ;;  %1052 = vmatprep.subr.bf16.mxu1 %v2379_v56 }
 0x3aa   :  { %1012 = vmatpush1.bf16.msra.mxu0 %v2316_v23  ;;  %1053 = vmatpush1.bf16.msra.mxu1 %v2384_v57 }
 0x3ab   :  { %1013 = vmatprep.subr.bf16.mxu0 %v2321_v28  ;;  %1054 = vmatprep.subr.bf16.mxu1 %v2387_v58 }
 0x3ae   :  { %1014 = vmatpush1.bf16.msra.mxu0 %v2326_v35  ;;  %1055 = vmatpush1.bf16.msra.mxu1 %v2392_v59 }
 0x3af   :  { %1015 = vmatprep.subr.bf16.mxu0 %v2330_v38  ;;  %1056 = vmatprep.subr.bf16.mxu1 %v2395_v60 }
 0x3b2   :  { %1016 = vmatpush1.bf16.msra.mxu0 %v2335_v44  ;;  %1057 = vmatpush1.bf16.msra.mxu1 %v2400_v61 }
 0x3b3   :  { %1017 = vmatprep.subr.bf16.mxu0 %v2338_v45  ;;  %1058 = vmatprep.subr.bf16.mxu1 %v2403_v62 }
 0x3b6   :  { %1018 = vmatpush1.bf16.msra.mxu0 %v2345_v48  ;;  %1059 = vmatpush1.bf16.msra.mxu1 %v2408_v63 }
 0x3b7   :  { %1132 = vmatprep.subr.bf16.mxu0 %v2282_v0  ;;  %1173 = vmatprep.subr.bf16.mxu1 %v2342_v47 }
 0x46c   :  { %v906_v1 = vpop.f32.mrb[12].mxu0  ;;  %v947_v3 = vpop.f32.mrb[20].mxu1 }
 0x46d   :  { %v958_v4 = vrot.slane %v906_v1, 5  ;;  %v908_v7 = vpop.f32.mrb[13].mxu0  ;;  %v949_v10 = vpop.f32.mrb[21].mxu1  ;;  %v960_v0 = vrot.slane %v947_v3, 5 }
 0x46e   :  { %v959_v11 = vrot.slane %v908_v7, 5  ;;  %v910_v12 = vpop.f32.mrb[14].mxu0  ;;  %v951_v36 = vpop.f32.mrb[22].mxu1  ;;  %v961_v46 = vrot.slane %v949_v10, 5 }
 0x46f   :  { %v966_v15 = vadd.f32 %v958_v4, %v2440_v32  ;;  %v911_v39 = vpop.f32.mrb[15].mxu0  ;;  %v952_v40 = vpop.f32.mrb[23].mxu1  ;;  %v968_v8 = vadd.f32 %v960_v0, %v2444_v9  ;;  %v2601_v12 = vld [vmem:[#allocation9 + $0x24] ss:$16 sps:$4 sm:$0xff]  }
 0x470   :  { %v967_v41 = vadd.f32 %v959_v11, %v2438_v31  ;;  %v969_v14 = vadd.f32 %v961_v46, %v2446_v6  ;;  %v2611_v36 = vld [vmem:[#allocation9 + $0x44] ss:$16 sps:$4 sm:$0xff]   ;;  %v2623_v40 = vld [vmem:[#allocation9 + $0x60] ss:$16 sps:$4 sm:$0xff]  }
 0x471   :  { %v1731_v42 = vmul.f32 -1.442695, %v966_v15  ;;  %v1733_v17 = vmul.f32 -1.442695, %v968_v8  ;;  %v2615_v15 = vld [vmem:[#allocation9 + $0x40] ss:$16 sps:$4 sm:$0xff]  }
 0x472   :  { %v1732_v43 = vmul.f32 -1.442695, %v967_v41  ;;  %v2619_v39 = vld [vmem:[#allocation9 + $0x64] ss:$16 sps:$4 sm:$0xff]  }
 0x473   :  { %1915 = vpow2.f32 %v1731_v42 }
 0x474   :  { %1917 = vpow2.f32 %v1732_v43 }
 0x475   :  { %1919 = vtanh.f32 %v969_v14 }
 0x476   :  { %1921 = vpow2.f32 %v1733_v17 }
 0x47d   :  { %v1916_v21 = vpop.eup %1915 }
 0x47e   :  { %v979_v30 = vadd.f32 1.0, %v1916_v21  ;;  %v1918_v13 = vpop.eup %1917 }
 0x47f   :  { %v980_v22 = vadd.f32 1.0, %v1918_v13  ;;  %v1920_v24 = vpop.eup %1919 }
 0x480   :  { %1923 = vrcp.f32 %v979_v30  ;;  %v1922_v16 = vpop.eup %1921 }
 0x481   :  { %1925 = vrcp.f32 %v980_v22  ;;  %v981_v29 = vadd.f32 1.0, %v1922_v16 }
 0x483   :  { %1927 = vrcp.f32 %v981_v29 }
 0x48a   :  { %v1924_v25 = vpop.eup %1923 }
 0x48b   :  { %v993_v27 = vmul.f32 %v1924_v25, %v1920_v24  ;;  %v1926_v20 = vpop.eup %1925 }
 0x48c   :  { %v992_v33 = vmul.f32 %v1926_v20, %v990_v18 }
 0x48d   :  { %v1928_v5 = vpop.eup %1927 }
 0x48e   :  { %v2590_v34 = vadd.f32 %v993_v27, %v992_v33 }
 0x490   :  { %1929 = vtanh.f32 %v2590_v34  ;;  %v1121_v29 = vrot.slane %v2590_v34, 7 }
 0x49a   :  { %v1930_v1 = vpop.eup %1929 }
 0x49b   :  { %v996_v3 = vmul.f32 %v1930_v1, %v1928_v5 }
 0x49d   :  { %v997_v4 = vpack.c.bf16 %v996_v3, %v996_v3  ;;  %v2595_v7 = vsel %vm143_vm2, %v2549_v37, %v996_v3  ;;  %v2607_v37 = vld [vmem:[#allocation9 + $0x20] ss:$16 sps:$4 sm:$0xff]  }
 0x49f   :  { %v999_v10 = vshrl.u32 %v997_v4, 16 }
 0x4a1   :  { %v1001_v11 = vrot.slane %v999_v10, 1 }
 0x4a3   :  { %1036 = vmatmul.mubr.bf16.vlgmr.msra.gmra.mrb[16].mxu0 %v1001_v11  ;;  %1077 = vmatmul.mubr.bf16.vlgmr.msra.gmra.mrb[24].mxu1 %v1001_v11 }
 0x4a4   :  { %1133 = vmatpush1.bf16.msra.mxu0 %v2597_v26  ;;  %1174 = vmatpush1.bf16.msra.mxu1 %v2348_v49 }
 0x4a5   :  { %1134 = vmatprep.subr.bf16.mxu0 %v2601_v12  ;;  %1175 = vmatprep.subr.bf16.mxu1 %v2351_v50 }
 0x4a6   :  { %1164 = vmatprep.mubr.bf16.mxu0 %v2172_v2  ;;  %1205 = vmatprep.mubr.bf16.mxu1 %v2172_v2 }
 0x4a8   :  { %1135 = vmatpush1.bf16.msra.mxu0 %v2607_v37  ;;  %1176 = vmatpush1.bf16.msra.mxu1 %v2354_v51 }
 0x4a9   :  { %1136 = vmatprep.subr.bf16.mxu0 %v2611_v36  ;;  %1177 = vmatprep.subr.bf16.mxu1 %v2358_v52 }
 0x4ac   :  { %1137 = vmatpush1.bf16.msra.mxu0 %v2615_v15  ;;  %1178 = vmatpush1.bf16.msra.mxu1 %v2368_v53 }
 0x4ad   :  { %1138 = vmatprep.subr.bf16.mxu0 %v2619_v39  ;;  %1179 = vmatprep.subr.bf16.mxu1 %v2371_v54 }
 0x4b0   :  { %1139 = vmatpush1.bf16.msra.mxu0 %v2623_v40  ;;  %1180 = vmatpush1.bf16.msra.mxu1 %v2376_v55 }
 0x4b1   :  { %1140 = vmatprep.subr.bf16.mxu0 %v2311_v19  ;;  %1181 = vmatprep.subr.bf16.mxu1 %v2379_v56  ;;  %v2643_v19 = vld [vmem:[#allocation9 + $0x4] ss:$16 sps:$4 sm:$0xff]  }
 0x4b4   :  { %1141 = vmatpush1.bf16.msra.mxu0 %v2316_v23  ;;  %1182 = vmatpush1.bf16.msra.mxu1 %v2384_v57 }
 0x4b5   :  { %1142 = vmatprep.subr.bf16.mxu0 %v2321_v28  ;;  %1183 = vmatprep.subr.bf16.mxu1 %v2387_v58 }
 0x4b8   :  { %1143 = vmatpush1.bf16.msra.mxu0 %v2326_v35  ;;  %1184 = vmatpush1.bf16.msra.mxu1 %v2392_v59 }
 0x4b9   :  { %1144 = vmatprep.subr.bf16.mxu0 %v2330_v38  ;;  %1185 = vmatprep.subr.bf16.mxu1 %v2395_v60 }
 0x4bc   :  { %1145 = vmatpush1.bf16.msra.mxu0 %v2335_v44  ;;  %1186 = vmatpush1.bf16.msra.mxu1 %v2400_v61 }
 0x4bd   :  { %1146 = vmatprep.subr.bf16.mxu0 %v2338_v45  ;;  %1187 = vmatprep.subr.bf16.mxu1 %v2403_v62 }
 0x4c0   :  { %1147 = vmatpush1.bf16.msra.mxu0 %v2345_v48  ;;  %1188 = vmatpush1.bf16.msra.mxu1 %v2408_v63 }
 0x4c1   :  { %1263 = vmatprep.subr.bf16.mxu0 %v2643_v19  ;;  %1304 = vmatprep.subr.bf16.mxu1 %v2342_v47 }
 0x576   :  { %v1037_v23 = vpop.f32.mrb[16].mxu0  ;;  %v1078_v28 = vpop.f32.mrb[24].mxu1 }
 0x577   :  { %v1089_v35 = vrot.slane %v1037_v23, 4  ;;  %v1039_v38 = vpop.f32.mrb[17].mxu0  ;;  %v1080_v44 = vpop.f32.mrb[25].mxu1  ;;  %v1091_v17 = vrot.slane %v1078_v28, 4 }
 0x578   :  { %v1090_v41 = vrot.slane %v1039_v38, 4  ;;  %v1041_v42 = vpop.f32.mrb[18].mxu0  ;;  %v1082_v45 = vpop.f32.mrb[26].mxu1  ;;  %v1092_v47 = vrot.slane %v1080_v44, 4 }
 0x579   :  { %v1097_v43 = vadd.f32 %v1089_v35, %v2440_v32  ;;  %v1042_v0 = vpop.f32.mrb[19].mxu0  ;;  %v1083_v48 = vpop.f32.mrb[27].mxu1  ;;  %v1099_v21 = vadd.f32 %v1091_v17, %v2444_v9 }
 0x57a   :  { %v1098_v46 = vadd.f32 %v1090_v41, %v2438_v31  ;;  %v1100_v30 = vadd.f32 %v1092_v47, %v2446_v6 }
 0x57b   :  { %v1734_v8 = vmul.f32 -1.442695, %v1097_v43  ;;  %v1736_v13 = vmul.f32 -1.442695, %v1099_v21 }
 0x57c   :  { %v1735_v14 = vmul.f32 -1.442695, %v1098_v46 }
 0x57d   :  { %1931 = vpow2.f32 %v1734_v8 }
 0x57e   :  { %1933 = vpow2.f32 %v1735_v14 }
 0x57f   :  { %1935 = vtanh.f32 %v1100_v30 }
 0x580   :  { %1937 = vpow2.f32 %v1736_v13 }
 0x587   :  { %v1932_v22 = vpop.eup %1931 }
 0x588   :  { %v1110_v24 = vadd.f32 1.0, %v1932_v22  ;;  %v1934_v16 = vpop.eup %1933 }
 0x589   :  { %v1111_v25 = vadd.f32 1.0, %v1934_v16  ;;  %v1936_v18 = vpop.eup %1935 }
 0x58a   :  { %1939 = vrcp.f32 %v1110_v24  ;;  %v1938_v27 = vpop.eup %1937 }
 0x58b   :  { %1941 = vrcp.f32 %v1111_v25  ;;  %v1112_v1 = vadd.f32 1.0, %v1938_v27 }
 0x58d   :  { %1943 = vrcp.f32 %v1112_v1 }
 0x594   :  { %v1940_v20 = vpop.eup %1939 }
 0x595   :  { %v1124_v33 = vmul.f32 %v1940_v20, %v1936_v18  ;;  %v1942_v5 = vpop.eup %1941 }
 0x596   :  { %v1123_v3 = vmul.f32 %v1942_v5, %v1121_v29 }
 0x597   :  { %v1944_v10 = vpop.eup %1943 }
 0x598   :  { %v2652_v4 = vadd.f32 %v1124_v33, %v1123_v3 }
 0x59a   :  { %1945 = vtanh.f32 %v2652_v4  ;;  %v1250_v16 = vrot.slane %v2652_v4, 7  ;;  %v2016_v4 = vld [vmem:[#allocation9 + $0x8] ss:$16 sps:$4 sm:$0xff]  }
 0x5a4   :  { %v1946_v11 = vpop.eup %1945 }
 0x5a5   :  { %v1127_v23 = vmul.f32 %v1946_v11, %v1944_v10 }
 0x5a7   :  { %v1128_v28 = vpack.c.bf16 %v1127_v23, %v1127_v23  ;;  %v2657_v35 = vsel %vm145_vm3, %v2595_v7, %v1127_v23 }
 0x5a9   :  { %v1130_v38 = vrot.slane %v1128_v28, 2  ;;  %v2017_v28 = vld [vmem:[#allocation9 + $0x2c] ss:$16 sps:$4 sm:$0xff]  }
 0x5ab   :  { %1165 = vmatmul.mubr.bf16.vlgmr.msra.gmra.mrb[20].mxu0 %v1130_v38  ;;  %1206 = vmatmul.mubr.bf16.vlgmr.msra.gmra.mrb[28].mxu1 %v1130_v38  ;;  %v2019_v38 = vld [vmem:[#allocation9 + $0x4c] ss:$16 sps:$4 sm:$0xff]  }
 0x5ac   :  { %1264 = vmatpush1.bf16.msra.mxu0 %v2597_v26  ;;  %1305 = vmatpush1.bf16.msra.mxu1 %v2348_v49  ;;  %v2675_v49 = vld [vmem:[#allocation9 + $0x84] ss:$16 sps:$4 sm:$0xff]  }
 0x5ad   :  { %1265 = vmatprep.subr.bf16.mxu0 %v2601_v12  ;;  %1306 = vmatprep.subr.bf16.mxu1 %v2351_v50  ;;  %v2679_v50 = vld [vmem:[#allocation9 + $0x80] ss:$16 sps:$4 sm:$0xff]  }
 0x5ae   :  { %1295 = vmatprep.mubr.bf16.mxu0 %v2172_v2  ;;  %1336 = vmatprep.mubr.bf16.mxu1 %v2172_v2 }
 0x5b0   :  { %1266 = vmatpush1.bf16.msra.mxu0 %v2607_v37  ;;  %1307 = vmatpush1.bf16.msra.mxu1 %v2354_v51  ;;  %v2683_v51 = vld [vmem:[#allocation9 + $0xa4] ss:$16 sps:$4 sm:$0xff]  }
 0x5b1   :  { %1267 = vmatprep.subr.bf16.mxu0 %v2611_v36  ;;  %1308 = vmatprep.subr.bf16.mxu1 %v2358_v52  ;;  %v2687_v52 = vld [vmem:[#allocation9 + $0xa0] ss:$16 sps:$4 sm:$0xff]  }
 0x5b4   :  { %1268 = vmatpush1.bf16.msra.mxu0 %v2615_v15  ;;  %1309 = vmatpush1.bf16.msra.mxu1 %v2368_v53  ;;  %v2691_v53 = vld [vmem:[#allocation9 + $0xc4] ss:$16 sps:$4 sm:$0xff]  }
 0x5b5   :  { %1269 = vmatprep.subr.bf16.mxu0 %v2619_v39  ;;  %1310 = vmatprep.subr.bf16.mxu1 %v2371_v54  ;;  %v2695_v54 = vld [vmem:[#allocation9 + $0xc0] ss:$16 sps:$4 sm:$0xff]  }
 0x5b8   :  { %1270 = vmatpush1.bf16.msra.mxu0 %v2623_v40  ;;  %1311 = vmatpush1.bf16.msra.mxu1 %v2376_v55  ;;  %v2699_v55 = vld [vmem:[#allocation9 + $0xe4] ss:$16 sps:$4 sm:$0xff]  }
 0x5b9   :  { %1271 = vmatprep.subr.bf16.mxu0 %v2675_v49  ;;  %1312 = vmatprep.subr.bf16.mxu1 %v2379_v56  ;;  %v2703_v56 = vld [vmem:[#allocation9 + $0xe0] ss:$16 sps:$4 sm:$0xff]  }
 0x5bc   :  { %1272 = vmatpush1.bf16.msra.mxu0 %v2679_v50  ;;  %1313 = vmatpush1.bf16.msra.mxu1 %v2384_v57  ;;  %v2015_v57 = vld [vmem:[#allocation9 + $0xc] ss:$16 sps:$4 sm:$0xff]  }
 0x5bd   :  { %1273 = vmatprep.subr.bf16.mxu0 %v2683_v51  ;;  %1314 = vmatprep.subr.bf16.mxu1 %v2387_v58 }
 0x5c0   :  { %1274 = vmatpush1.bf16.msra.mxu0 %v2687_v52  ;;  %1315 = vmatpush1.bf16.msra.mxu1 %v2392_v59 }
 0x5c1   :  { %1275 = vmatprep.subr.bf16.mxu0 %v2691_v53  ;;  %1316 = vmatprep.subr.bf16.mxu1 %v2395_v60 }
 0x5c4   :  { %1276 = vmatpush1.bf16.msra.mxu0 %v2695_v54  ;;  %1317 = vmatpush1.bf16.msra.mxu1 %v2400_v61 }
 0x5c5   :  { %1277 = vmatprep.subr.bf16.mxu0 %v2699_v55  ;;  %1318 = vmatprep.subr.bf16.mxu1 %v2403_v62 }
 0x5c8   :  { %1278 = vmatpush1.bf16.msra.mxu0 %v2703_v56  ;;  %1319 = vmatpush1.bf16.msra.mxu1 %v2408_v63 }
 0x5c9   :  { %1392 = vmatprep.subr.bf16.mxu0 %v2643_v19  ;;  %1433 = vmatprep.subr.bf16.mxu1 %v2015_v57  ;;  %v2022_v57 = vld [vmem:[#allocation9 + $0x68] ss:$16 sps:$4 sm:$0xff]  }
 0x67e   :  { %v1166_v58 = vpop.f32.mrb[20].mxu0  ;;  %v1207_v59 = vpop.f32.mrb[28].mxu1 }
 0x67f   :  { %v1218_v60 = vrot.slane %v1166_v58, 3  ;;  %v1168_v61 = vpop.f32.mrb[21].mxu0  ;;  %v1209_v34 = vpop.f32.mrb[29].mxu1  ;;  %v1220_v19 = vrot.slane %v1207_v59, 3 }
 0x680   :  { %v1219_v7 = vrot.slane %v1168_v61, 3  ;;  %v1170_v44 = vpop.f32.mrb[22].mxu0  ;;  %v1211_v41 = vpop.f32.mrb[30].mxu1  ;;  %v1221_v48 = vrot.slane %v1209_v34, 3 }
 0x681   :  { %v1226_v62 = vadd.f32 %v1218_v60, %v2440_v32  ;;  %v1171_v42 = vpop.f32.mrb[23].mxu0  ;;  %v1212_v45 = vpop.f32.mrb[31].mxu1  ;;  %v1228_v46 = vadd.f32 %v1220_v19, %v2444_v9 }
 0x682   :  { %v1227_v43 = vadd.f32 %v1219_v7, %v2438_v31  ;;  %v1229_v8 = vadd.f32 %v1221_v48, %v2446_v6 }
 0x683   :  { %v1737_v0 = vmul.f32 -1.442695, %v1226_v62  ;;  %v1739_v14 = vmul.f32 -1.442695, %v1228_v46 }
 0x684   :  { %v1738_v63 = vmul.f32 -1.442695, %v1227_v43 }
 0x685   :  { %1947 = vpow2.f32 %v1737_v0 }
 0x686   :  { %1949 = vpow2.f32 %v1738_v63 }
 0x687   :  { %1951 = vtanh.f32 %v1229_v8 }
 0x688   :  { %1953 = vpow2.f32 %v1739_v14 }
 0x68f   :  { %v1948_v17 = vpop.eup %1947 }
 0x690   :  { %v1239_v47 = vadd.f32 1.0, %v1948_v17  ;;  %v1950_v21 = vpop.eup %1949 }
 0x691   :  { %v1240_v30 = vadd.f32 1.0, %v1950_v21  ;;  %v1952_v13 = vpop.eup %1951 }
 0x692   :  { %1955 = vrcp.f32 %v1239_v47  ;;  %v1954_v22 = vpop.eup %1953 }
 0x693   :  { %1957 = vrcp.f32 %v1240_v30  ;;  %v1241_v27 = vadd.f32 1.0, %v1954_v22 }
 0x695   :  { %1959 = vrcp.f32 %v1241_v27 }
 0x69c   :  { %v1956_v24 = vpop.eup %1955 }
 0x69d   :  { %v1253_v25 = vmul.f32 %v1956_v24, %v1952_v13  ;;  %v1958_v18 = vpop.eup %1957 }
 0x69e   :  { %v1252_v20 = vmul.f32 %v1958_v18, %v1250_v16 }
 0x69f   :  { %v1960_v33 = vpop.eup %1959 }
 0x6a0   :  { %v2713_v29 = vadd.f32 %v1253_v25, %v1252_v20 }
 0x6a2   :  { %1961 = vtanh.f32 %v2713_v29  ;;  %v1381_v47 = vrot.slane %v2713_v29, 7  ;;  %v1859_v29 = vld [vmem:[#allocation10] sm:$0xff]  }
 0x6ac   :  { %v1962_v5 = vpop.eup %1961 }
 0x6ad   :  { %v1256_v1 = vmul.f32 %v1962_v5, %v1960_v33  ;;  %v2173_v5 = vmov 0.0  }
 0x6af   :  { %v1257_v3 = vpack.c.bf16 %v1256_v1, %v1256_v1  ;;  %v2718_v10 = vsel %vm147_vm4, %v2657_v35, %v1256_v1  ;;  %v2018_v35 = vld [vmem:[#allocation9 + $0x28] ss:$16 sps:$4 sm:$0xff]  }
 0x6b0   :  { %v1860_v1 = vld [vmem:[#allocation10 + $0x8] sm:$0xff]  }
 0x6b1   :  { %v1259_v11 = vshrl.u32 %v1257_v3, 16  ;;  %v1861_v3 = vld [vmem:[#allocation10 + $0x10] sm:$0xff]  }
 0x6b3   :  { %v1261_v23 = vrot.slane %v1259_v11, 2  ;;  %v1862_v11 = vld [vmem:[#allocation10 + $0x18] sm:$0xff]  }
 0x6b5   :  { %1296 = vmatmul.mubr.bf16.vlgmr.msra.gmra.mrb[24].mxu0 %v1261_v23  ;;  %1337 = vmatmul.mubr.bf16.vlgmr.msra.gmra.mrb[32].mxu1 %v1261_v23  ;;  %v1863_v23 = vld [vmem:[#allocation10 + $0x20] sm:$0xff]  }
 0x6b6   :  { %1393 = vmatpush1.bf16.msra.mxu0 %v2597_v26  ;;  %1434 = vmatpush1.bf16.msra.mxu1 %v2016_v4  ;;  %v2020_v26 = vld [vmem:[#allocation9 + $0x48] ss:$16 sps:$4 sm:$0xff]   ;;  %v1865_v4 = vld [vmem:[#allocation10 + $0x30] sm:$0xff]  }
 0x6b7   :  { %1394 = vmatprep.subr.bf16.mxu0 %v2601_v12  ;;  %1435 = vmatprep.subr.bf16.mxu1 %v2017_v28  ;;  %v2021_v12 = vld [vmem:[#allocation9 + $0x6c] ss:$16 sps:$4 sm:$0xff]  }
 0x6b8   :  { %1424 = vmatprep.mubr.bf16.mxu0 %v2172_v2  ;;  %1465 = vmatprep.mubr.bf16.mxu1 %v2172_v2  ;;  %v2023_v2 = vld [vmem:[#allocation9 + $0x8c] ss:$16 sps:$4 sm:$0xff]  }
 0x6b9   :  { %v1866_v28 = vld [vmem:[#allocation10 + $0x38] sm:$0xff]  }
 0x6ba   :  { %1395 = vmatpush1.bf16.msra.mxu0 %v2607_v37  ;;  %1436 = vmatpush1.bf16.msra.mxu1 %v2018_v35  ;;  %v2024_v37 = vld [vmem:[#allocation9 + $0x88] ss:$16 sps:$4 sm:$0xff]  }
 0x6bb   :  { %1396 = vmatprep.subr.bf16.mxu0 %v2611_v36  ;;  %1437 = vmatprep.subr.bf16.mxu1 %v2019_v38  ;;  %v2025_v36 = vld [vmem:[#allocation9 + $0xac] ss:$16 sps:$4 sm:$0xff]  }
 0x6be   :  { %1397 = vmatpush1.bf16.msra.mxu0 %v2615_v15  ;;  %1438 = vmatpush1.bf16.msra.mxu1 %v2020_v26  ;;  %v2026_v15 = vld [vmem:[#allocation9 + $0xa8] ss:$16 sps:$4 sm:$0xff]  }
 0x6bf   :  { %1398 = vmatprep.subr.bf16.mxu0 %v2619_v39  ;;  %1439 = vmatprep.subr.bf16.mxu1 %v2021_v12  ;;  %v2027_v39 = vld [vmem:[#allocation9 + $0xcc] ss:$16 sps:$4 sm:$0xff]  }
 0x6c2   :  { %1399 = vmatpush1.bf16.msra.mxu0 %v2623_v40  ;;  %1440 = vmatpush1.bf16.msra.mxu1 %v2022_v57  ;;  %v2028_v40 = vld [vmem:[#allocation9 + $0xc8] ss:$16 sps:$4 sm:$0xff]  }
 0x6c3   :  { %1400 = vmatprep.subr.bf16.mxu0 %v2675_v49  ;;  %1441 = vmatprep.subr.bf16.mxu1 %v2023_v2  ;;  %v2029_v49 = vld [vmem:[#allocation9 + $0xec] ss:$16 sps:$4 sm:$0xff]  }
 0x6c6   :  { %1401 = vmatpush1.bf16.msra.mxu0 %v2679_v50  ;;  %1442 = vmatpush1.bf16.msra.mxu1 %v2024_v37  ;;  %v2030_v50 = vld [vmem:[#allocation9 + $0xe8] ss:$16 sps:$4 sm:$0xff]  }
 0x6c7   :  { %1402 = vmatprep.subr.bf16.mxu0 %v2683_v51  ;;  %1443 = vmatprep.subr.bf16.mxu1 %v2025_v36 }
 0x6ca   :  { %1403 = vmatpush1.bf16.msra.mxu0 %v2687_v52  ;;  %1444 = vmatpush1.bf16.msra.mxu1 %v2026_v15 }
 0x6cb   :  { %1404 = vmatprep.subr.bf16.mxu0 %v2691_v53  ;;  %1445 = vmatprep.subr.bf16.mxu1 %v2027_v39 }
 0x6ce   :  { %1405 = vmatpush1.bf16.msra.mxu0 %v2695_v54  ;;  %1446 = vmatpush1.bf16.msra.mxu1 %v2028_v40 }
 0x6cf   :  { %1406 = vmatprep.subr.bf16.mxu0 %v2699_v55  ;;  %1447 = vmatprep.subr.bf16.mxu1 %v2029_v49 }
 0x6d2   :  { %1407 = vmatpush1.bf16.msra.mxu0 %v2703_v56  ;;  %1448 = vmatpush1.bf16.msra.mxu1 %v2030_v50 }
 0x6d3   :  { %1764 = vmatprep.subr.bf16.mxu0 %v2173_v5 }
 0x788   :  { %v1297_v51 = vpop.f32.mrb[24].mxu0  ;;  %v1338_v52 = vpop.f32.mrb[32].mxu1 }
 0x789   :  { %v1349_v58 = vrot.slane %v1297_v51, 2  ;;  %v1299_v59 = vpop.f32.mrb[25].mxu0  ;;  %v1340_v60 = vpop.f32.mrb[33].mxu1  ;;  %v1351_v56 = vrot.slane %v1338_v52, 2 }
 0x78a   :  { %v1350_v53 = vrot.slane %v1299_v59, 2  ;;  %v1301_v61 = vpop.f32.mrb[26].mxu0  ;;  %v1342_v34 = vpop.f32.mrb[34].mxu1  ;;  %v1352_v42 = vrot.slane %v1340_v60, 2 }
 0x78b   :  { %v1357_v54 = vadd.f32 %v1349_v58, %v2440_v32  ;;  %v1302_v7 = vpop.f32.mrb[27].mxu0  ;;  %v1343_v44 = vpop.f32.mrb[35].mxu1  ;;  %v1359_v45 = vadd.f32 %v1351_v56, %v2444_v9 }
 0x78c   :  { %v1358_v55 = vadd.f32 %v1350_v53, %v2438_v31  ;;  %v1360_v43 = vadd.f32 %v1352_v42, %v2446_v6 }
 0x78d   :  { %v1740_v41 = vmul.f32 -1.442695, %v1357_v54  ;;  %v1742_v0 = vmul.f32 -1.442695, %v1359_v45 }
 0x78e   :  { %v1741_v62 = vmul.f32 -1.442695, %v1358_v55 }
 0x78f   :  { %1963 = vpow2.f32 %v1740_v41 }
 0x790   :  { %1965 = vpow2.f32 %v1741_v62 }
 0x791   :  { %1967 = vtanh.f32 %v1360_v43 }
 0x792   :  { %1969 = vpow2.f32 %v1742_v0 }
 0x799   :  { %v1964_v63 = vpop.eup %1963 }
 0x79a   :  { %v1370_v19 = vadd.f32 1.0, %v1964_v63  ;;  %v1966_v48 = vpop.eup %1965 }
 0x79b   :  { %v1371_v46 = vadd.f32 1.0, %v1966_v48  ;;  %v1968_v8 = vpop.eup %1967 }
 0x79c   :  { %1971 = vrcp.f32 %v1370_v19  ;;  %v1970_v14 = vpop.eup %1969  ;;  %v1746_v19 = vld [vmem:[%s2777_s6] ss:$0 sm:$0xff]  ;;  %s2129_s6 = scalar_lea.vmem %s1654_s9, 128 }
 0x79d   :  { %1973 = vrcp.f32 %v1371_v46  ;;  %v1372_v13 = vadd.f32 1.0, %v1970_v14  ;;  %p2130_p7 = scmp.ne.s32.totalorder %s1654_s9, %s2129_s6  ;;  %p2135_p9 = scmp.lt.s32.totalorder %s2129_s6, %s2129_s6 }
 0x79f   :  { %1975 = vrcp.f32 %v1372_v13  ;;  %p2136_p10 = por %p2135_p9, %p2134_p8 }
 0x7a1   :  { %p2137_p11 = pnand %p2136_p10, %p2130_p7 }
 0x7a6   :  { %v1972_v17 = vpop.eup %1971 }
 0x7a7   :  { %v1384_v21 = vmul.f32 %v1972_v17, %v1968_v8  ;;  %v1974_v30 = vpop.eup %1973 }
 0x7a8   :  { %v1383_v22 = vmul.f32 %v1974_v30, %v1381_v47 }
 0x7a9   :  { %v1976_v16 = vpop.eup %1975 }
 0x7aa   :  { %v2742_v24 = vadd.f32 %v1384_v21, %v1383_v22 }
 0x7ac   :  { %1977 = vtanh.f32 %v2742_v24  ;;  %v1510_v55 = vrot.slane %v2742_v24, 7 }
 0x7b6   :  { %v1978_v25 = vpop.eup %1977 }
 0x7b7   :  { %v1387_v18 = vmul.f32 %v1978_v25, %v1976_v16 }
 0x7b9   :  { %v1388_v27 = vpack.c.bf16 %v1387_v18, %v1387_v18  ;;  %v2747_v20 = vsel %vm149_vm5, %v2718_v10, %v1387_v18  ;;  %v1864_v10 = vld [vmem:[#allocation10 + $0x28] sm:$0xff]  }
 0x7bb   :  { %v1390_v33 = vrot.slane %v1388_v27, 3 }
 0x7bd   :  { %1425 = vmatmul.mubr.bf16.vlgmr.msra.gmra.mrb[28].mxu0 %v1390_v33  ;;  %1466 = vmatmul.mubr.bf16.vlgmr.msra.gmra.mrb[36].mxu1 %v1390_v33 }
 0x7be   :  { %1765 = vmatpush3.bf16.msra.mxu0 %v1859_v29  ;;  %1780 = vmatprep.mubr.msk.bf16.mxu0 %vm2174_vm8, %v2173_v5 }
 0x7bf   :  { %1766 = vmatprep.subr.bf16.mxu0 %v2173_v5 }
 0x7c2   :  { %1767 = vmatpush3.bf16.msra.mxu0 %v1860_v1 }
 0x7c3   :  { %1768 = vmatprep.subr.bf16.mxu0 %v2173_v5 }
 0x7c6   :  { %1769 = vmatpush3.bf16.msra.mxu0 %v1861_v3 }
 0x7c7   :  { %1770 = vmatprep.subr.bf16.mxu0 %v2173_v5 }
 0x7ca   :  { %1771 = vmatpush3.bf16.msra.mxu0 %v1862_v11 }
 0x7cb   :  { %1772 = vmatprep.subr.bf16.mxu0 %v2173_v5 }
 0x7ce   :  { %1773 = vmatpush3.bf16.msra.mxu0 %v1863_v23 }
 0x7cf   :  { %1774 = vmatprep.subr.bf16.mxu0 %v2173_v5 }
 0x7d2   :  { %1775 = vmatpush3.bf16.msra.mxu0 %v1864_v10 }
 0x7d3   :  { %1776 = vmatprep.subr.bf16.mxu0 %v2173_v5 }
 0x7d6   :  { %1777 = vmatpush3.bf16.msra.mxu0 %v1865_v4 }
 0x7d7   :  { %1778 = vmatprep.subr.bf16.mxu0 %v2173_v5 }
 0x7da   :  { %1779 = vmatpush3.bf16.msra.mxu0 %v1866_v28 }
 0x890   :  { %v1426_v35 = vpop.f32.mrb[28].mxu0  ;;  %v1467_v38 = vpop.f32.mrb[36].mxu1 }
 0x891   :  { %v1478_v26 = vrot.slane %v1426_v35, 1  ;;  %v1428_v12 = vpop.f32.mrb[29].mxu0  ;;  %v1469_v57 = vpop.f32.mrb[37].mxu1  ;;  %v1480_v52 = vrot.slane %v1467_v38, 1 }
 0x892   :  { %v1479_v2 = vrot.slane %v1428_v12, 1  ;;  %v1430_v37 = vpop.f32.mrb[30].mxu0  ;;  %v1471_v36 = vpop.f32.mrb[38].mxu1  ;;  %v1481_v58 = vrot.slane %v1469_v57, 1 }
 0x893   :  { %v1486_v15 = vadd.f32 %v1478_v26, %v2440_v32  ;;  %v1431_v39 = vpop.f32.mrb[31].mxu0  ;;  %v1472_v40 = vpop.f32.mrb[39].mxu1  ;;  %v1488_v59 = vadd.f32 %v1480_v52, %v2444_v9 }
 0x894   :  { %v1487_v49 = vadd.f32 %v1479_v2, %v2438_v31  ;;  %v1489_v60 = vadd.f32 %v1481_v58, %v2446_v6 }
 0x895   :  { %v1743_v50 = vmul.f32 -1.442695, %v1486_v15  ;;  %v1745_v53 = vmul.f32 -1.442695, %v1488_v59 }
 0x896   :  { %v1744_v51 = vmul.f32 -1.442695, %v1487_v49 }
 0x897   :  { %1979 = vpow2.f32 %v1743_v50 }
 0x898   :  { %1981 = vpow2.f32 %v1744_v51 }
 0x899   :  { %1983 = vtanh.f32 %v1489_v60 }
 0x89a   :  { %1985 = vpow2.f32 %v1745_v53 }
 0x8a1   :  { %v1980_v61 = vpop.eup %1979 }
 0x8a2   :  { %v1499_v34 = vadd.f32 1.0, %v1980_v61  ;;  %v1982_v54 = vpop.eup %1981 }
 0x8a3   :  { %v1500_v32 = vadd.f32 1.0, %v1982_v54  ;;  %v1984_v31 = vpop.eup %1983 }
 0x8a4   :  { %1987 = vrcp.f32 %v1499_v34  ;;  %v1986_v7 = vpop.eup %1985 }
 0x8a5   :  { %1989 = vrcp.f32 %v1500_v32  ;;  %v1501_v56 = vadd.f32 1.0, %v1986_v7 }
 0x8a7   :  { %1991 = vrcp.f32 %v1501_v56 }
 0x8ae   :  { %v1988_v44 = vpop.eup %1987 }
 0x8af   :  { %v1513_v41 = vmul.f32 %v1988_v44, %v1984_v31  ;;  %v1990_v62 = vpop.eup %1989 }
 0x8b0   :  { %v1512_v9 = vmul.f32 %v1990_v62, %v1510_v55 }
 0x8b1   :  { %v1992_v6 = vpop.eup %1991 }
 0x8b2   :  { %v1514_v42 = vadd.f32 %v1513_v41, %v1512_v9 }
 0x8b4   :  { %1993 = vtanh.f32 %v1514_v42 }
 0x8be   :  { %v1994_v45 = vpop.eup %1993 }
 0x8bf   :  { %v1516_v43 = vmul.f32 %v1994_v45, %v1992_v6 }
 0x8c1   :  { %v1523_v0 = vsel %vm151_vm6, %v2747_v20, %v1516_v43 }
 0x8c2   :  { %v1524_v63 = vpack.c.bf16 %v1523_v0, %v1523_v0 }
 0x8c4   :  { %1781 = vmatmul.mubr.bf16.vlgmr.msra.gmra.mrb[32].mxu0 %v1524_v63 }
 0x997   :  { %v1630_v48 = vpop.f32.mrb[32].mxu0 }
 0x998   :  { %v1631_v46 = vadd.f32 %v1746_v19, %v1630_v48  ;;  %v1782_v8 = vpop.f32.mrb[33].mxu0 }
 0x999   :  { %v1633_v14 = vpop.f32.mrb[34].mxu0 }
 0x99a   :  { %1636 = vmax.xlane.f32.xlu0 %v1631_v46  ;;  %v1783_v17 = vpop.f32.mrb[35].mxu0 }
 0xa27   :  { %v1637_v47 = vpop.xlane.xlu0 %1636 }
 0xa28   :  { %v1638_v21 = vsub.f32 %v1631_v46, %v1637_v47 }
 0xa2a   :  { %v1639_v30 = vmul.f32 1.442695, %v1638_v21 }
 0xa2c   :  { %1995 = vpow2.f32 %v1639_v30 }
 0xa36   :  { %v1996_v13 = vpop.eup %1995 }
 0xa37   :  { %1641 = vadd.xlane.f32.xlu0 %v1996_v13 }
 0xac4   :  { %v1642_v22 = vpop.xlane.xlu0 %1641 }
 0xac5   :  { %1997 = vlog2.f32 %v1642_v22 }
 0xacf   :  { %v1998_v24 = vpop.eup %1997 }
 0xad0   :  { %v1644_v16 = vmul.f32 0.6931472, %v1998_v24 }
 0xad2   :  { %v1645_v25 = vsub.f32 %v1638_v21, %v1644_v16 }
 0xad4   :  { %1646 = vst [vmem:[#allocation12] sm:$0xff] %v1645_v25 }
 0xad5   :  { %2140 = shalt.err (!%p2137_p11)
}
 0xad6   :  { %s2141_s13 = scalar_lea.hbm %s2778_s7, 128 }
 0xad7   :  { %p2142_p12 = scmp.ne.s32.totalorder %s2778_s7, %s2141_s13  ;;  %p2145_p13 = scmp.lt.u32.totalorder %s2141_s13, %s2778_s7 }
 0xad9   :  { %p2147_p0 = pnand %p2145_p13, %p2142_p12 }
 0xadb   :  { %2150 = shalt.err (!%p2147_p0)
}
 0xadc   :  { %1656 = dma.vmem_to_hbm [thread:$0]  %s1654_s9, 128, %s2778_s7, [#allocation4]  }
 0xadd   :  { %2159 = dma.done.wait [#allocation4], 128  }
 0xade   :  { %2160 = vsyncadd [#allocation4], 4294967168 }
 0xadf   :  { %1660 = vsyncpa [#allocation3], 1 }
 0xae0   :  { %1661 = vsyncpa [#allocation8], 1 }
 0xae1   :  { %1662 = vsyncpa [#allocation11], 1 }
 0xae2   :  { %1663 = vsyncpa [#allocation4], 1 }
 0xae3   :  { %1664 = vsyncpa [#allocation5], 1 }

</bundles_post_ra>
